<compile_context>
chip_gen: v7x
topology: tpu7x:2x2x1
jax: 0.10.0
libtpu: 0.0.40
codegen_flags: <defaults>
</compile_context>

<pallas_src>
import jax
import jax.numpy as jnp
import numpy as np
from jax.experimental import pallas as pl
from jax.experimental.pallas import tpu as pltpu


# ----------------------------------------------------------------------------
# Pallas kernel: in-VMEM im2col -> conv3x3 -> ReLU -> transpose-conv (k=2,s=2)
# ----------------------------------------------------------------------------
def _bridge_up_kernel(x_ref, w1_ref, b1_ref, w2_ref, b2_ref, o_ref):
    # x_ref : (1, H+2, W+2, C_in)  halo-padded NHWC image of one batch element;
    #                              block index only depends on the batch grid axis,
    #                              so it stays resident in VMEM across row tiles.
    # w1_ref: (9, C_in, C_in)      3x3 conv weight: w1_ref[kh*3+kw][ci, co]
    # b1_ref: (1, C_in)
    # w2_ref: (2, C_in, 2*C_out)   transpose-conv weight: w2_ref[kh][ci, kw*C_out+co]
    # b2_ref: (1, 2*C_out)
    # o_ref : (1, TH, 2, W, 2*C_out)   fused depth-to-space output layout
    _, th, _, w_out, n2 = o_ref.shape
    c_in = x_ref.shape[3]
    r = pl.program_id(1)
    row0 = pl.multiple_of(r * th, th)

    # ---- conv 3x3 (pad=1) as 9 shifted-window matmuls, all windows read from VMEM.
    y = None
    for kh in range(3):
        for kw in range(3):
            window = x_ref[0, pl.ds(row0 + kh, th), pl.ds(kw, w_out), :]
            window = window.reshape(th * w_out, c_in)          # leading-dim collapse (free)
            part = jnp.dot(window, w1_ref[kh * 3 + kw],
                           preferred_element_type=jnp.float32)
            y = part if y is None else y + part
    y = jnp.maximum(y + b1_ref[...], 0.0)                      # bias + ReLU (f32, VPU)

    # ---- ConvTranspose2d(k=2, s=2) has non-overlapping taps -> per-pixel matmul.
    # Split by output-row parity kh so each store is a plain (TH, W, 2*C_out) slab;
    # the depth-to-space is finished by a free reshape in the wrapper.
    for kh in range(2):
        z = jnp.dot(y, w2_ref[kh], preferred_element_type=jnp.float32) + b2_ref[...]
        o_ref[0, :, kh, :, :] = z.reshape(th, w_out, n2).astype(o_ref.dtype)


# ----------------------------------------------------------------------------
# Helpers
# ----------------------------------------------------------------------------
def _pick_row_tile(h, w):
    """Largest row tile dividing H with at most ~4K pixels per matmul tile."""
    best = 1
    for th in range(1, h + 1):
        if h % th == 0 and th * w <= 4096:
            best = th
    return best


def _padded_tile_bytes(shape, dtype_bytes=4):
    """VMEM footprint of one block: minor two dims padded to (8, 128) tiles."""
    shape = tuple(shape)
    if len(shape) == 1:
        shape = (1,) + shape
    *outer, s, l = shape
    rows = -(-s // 8) * 8
    lanes = -(-l // 128) * 128
    n_outer = 1
    for d in outer:
        n_outer *= d
    return n_outer * rows * lanes * dtype_bytes


def _bridge_up_pallas(xpad, w1_9, b1_row, w2_split, b2_row, *, th):
    """xpad: (B, H+2, W+2, C_in) -> (B, H, 2, W, 2*C_out) fused-output layout."""
    B, Hp2, Wp2, C_in = xpad.shape
    H, W = Hp2 - 2, Wp2 - 2
    n2 = w2_split.shape[2]             # 2*C_out
    C_out = n2 // 2
    grid = (B, H // th)                # >= 2 steps (B>=2) so both v7x TCs get work

    # VMEM budget: inputs/outputs are double-buffered; keep well under the 32 MiB
    # default scoped limit (v7x physical VMEM is only 64 MiB).
    vmem_est = (2 * (_padded_tile_bytes((1, Hp2, Wp2, C_in))
                     + _padded_tile_bytes((1, th, 2, W, n2)))
                + 2 * (_padded_tile_bytes((9, C_in, C_in))
                       + _padded_tile_bytes((2, C_in, n2))
                       + _padded_tile_bytes((1, C_in))
                       + _padded_tile_bytes((1, n2))))
    assert vmem_est < 32 * 1024 * 1024, f"VMEM estimate too large: {vmem_est}"

    flops = 2 * B * H * W * (9 * C_in * C_in + C_in * 4 * C_out)
    bytes_accessed = 4 * (B * Hp2 * Wp2 * C_in          # read x once
                          + B * H * 2 * W * n2          # write output once
                          + 9 * C_in * C_in + 2 * C_in * n2 + C_in + n2)

    return pl.pallas_call(
        _bridge_up_kernel,
        out_shape=jax.ShapeDtypeStruct((B, H, 2, W, n2), jnp.float32),
        grid_spec=pltpu.PrefetchScalarGridSpec(
            num_scalar_prefetch=0,
            grid=grid,
            in_specs=[
                pl.BlockSpec((1, Hp2, Wp2, C_in), lambda b, r: (b, 0, 0, 0)),
                pl.BlockSpec((9, C_in, C_in), lambda b, r: (0, 0, 0)),
                pl.BlockSpec((1, C_in), lambda b, r: (0, 0)),
                pl.BlockSpec((2, C_in, n2), lambda b, r: (0, 0, 0)),
                pl.BlockSpec((1, n2), lambda b, r: (0, 0)),
            ],
            out_specs=pl.BlockSpec((1, th, 2, W, n2),
                                   lambda b, r: (b, r, 0, 0, 0)),
        ),
        compiler_params=pltpu.CompilerParams(
            dimension_semantics=("parallel", "arbitrary")),
        cost_estimate=pl.CostEstimate(flops=flops, transcendentals=0,
                                      bytes_accessed=bytes_accessed),
    )(xpad, w1_9, b1_row, w2_split, b2_row)


# ----------------------------------------------------------------------------
# Wrapper: NCHW in / NCHW out, matching PyTorch BridgeUP.forward
# ----------------------------------------------------------------------------
@jax.jit
def bridge_up_forward(x_nchw, w1, b1, wt, bt):
    """
    x_nchw: (B, C_in, H, W)
    w1    : (C_in, C_in, 3, 3)   -- nn.Conv2d weight   (out, in, kh, kw)
    b1    : (C_in,)
    wt    : (C_in, C_out, 2, 2)  -- nn.ConvTranspose2d weight (in, out, kh, kw)
    bt    : (C_out,)
    returns (B, C_out, 2H, 2W)
    """
    B, C_in, H, W = x_nchw.shape
    C_out = wt.shape[1]
    th = _pick_row_tile(H, W)

    # glue: NHWC + halo pad (single pass over the *small* input)
    x = jnp.transpose(x_nchw, (0, 2, 3, 1)).astype(jnp.float32)
    xpad = jnp.pad(x, ((0, 0), (1, 1), (1, 1), (0, 0)))

    # weights in matmul form
    # w1_9[kh*3+kw, ci, co] = w1[co, ci, kh, kw]
    w1_9 = jnp.transpose(w1, (2, 3, 1, 0)).reshape(9, C_in, C_in).astype(jnp.float32)
    # w2_split[kh, ci, kw*C_out+co] = wt[ci, co, kh, kw]
    w2_split = jnp.transpose(wt, (2, 0, 3, 1)).reshape(2, C_in, 2 * C_out).astype(jnp.float32)
    b1_row = b1.reshape(1, C_in).astype(jnp.float32)
    b2_row = jnp.tile(bt, 2).reshape(1, 2 * C_out).astype(jnp.float32)

    out5 = _bridge_up_pallas(xpad, w1_9, b1_row, w2_split, b2_row, th=th)

    # (B, H, 2, W, 2*C_out) -> (B, 2H, 2W, C_out): pure (free) reshape — the
    # depth-to-space interleave was already fused into the kernel's output layout.
    out_nhwc = out5.reshape(B, 2 * H, 2 * W, C_out)
    return jnp.transpose(out_nhwc, (0, 3, 1, 2))              # NCHW (PyTorch convention)


# ----------------------------------------------------------------------------
# Pure NumPy reference (matches PyTorch semantics) for validation
# ----------------------------------------------------------------------------
def _reference(x, w1, b1, wt, bt):
    x, w1, b1, wt, bt = (np.asarray(a, dtype=np.float64) for a in (x, w1, b1, wt, bt))
    B, C_in, H, W = x.shape
    C_out = wt.shape[1]
    xpad = np.pad(x, ((0, 0), (0, 0), (1, 1), (1, 1)))
    # Conv2d 3x3, padding=1
    y = np.zeros((B, C_in, H, W), dtype=np.float64)
    for kh in range(3):
        for kw in range(3):
            y += np.einsum("oc,bchw->bohw", w1[:, :, kh, kw],
                           xpad[:, :, kh:kh + H, kw:kw + W])
    y += b1[None, :, None, None]
    y = np.maximum(y, 0.0)
    # ConvTranspose2d k=2 s=2 (non-overlapping)
    z = np.zeros((B, C_out, 2 * H, 2 * W), dtype=np.float64)
    for kh in range(2):
        for kw in range(2):
            z[:, :, kh::2, kw::2] = np.einsum("io,bihw->bohw", wt[:, :, kh, kw], y)
    z += bt[None, :, None, None]
    return z


if __name__ == "__main__":
    B, C_in, C_out, H, W = 2, 4, 8, 16, 16

    key = jax.random.PRNGKey(0)
    k1, k2, k3, k4, k5 = jax.random.split(key, 5)
    x = jax.random.normal(k1, (B, C_in, H, W), dtype=jnp.float32)
    w1 = jax.random.normal(k2, (C_in, C_in, 3, 3), dtype=jnp.float32) * 0.1
    b1 = jax.random.normal(k3, (C_in,), dtype=jnp.float32) * 0.1
    wt = jax.random.normal(k4, (C_in, C_out, 2, 2), dtype=jnp.float32) * 0.1
    bt = jax.random.normal(k5, (C_out,), dtype=jnp.float32) * 0.1

    out = jax.block_until_ready(bridge_up_forward(x, w1, b1, wt, bt))
    assert out.shape == (B, C_out, 2 * H, 2 * W), out.shape

    ref = _reference(x, w1, b1, wt, bt)
    # Tolerance accounts for the MXU's default f32 matmul precision.
    np.testing.assert_allclose(np.asarray(out), ref, atol=1e-2, rtol=1e-2)

    print("KERNEL_OK")
</pallas_src>

<mosaic_0001>
module attributes {stable_mosaic.version = 11 : i64} {
  func.func @_bridge_up_kernel(%arg0: i32, %arg1: i32, %arg2: memref<1x18x18x4xf32, #tpu.memory_space<vmem>>, %arg3: memref<9x4x4xf32, #tpu.memory_space<vmem>>, %arg4: memref<1x4xf32, #tpu.memory_space<vmem>>, %arg5: memref<2x4x16xf32, #tpu.memory_space<vmem>>, %arg6: memref<1x16xf32, #tpu.memory_space<vmem>>, %arg7: memref<1x16x2x16x16xf32, #tpu.memory_space<vmem>>) attributes {dimension_semantics = [#tpu.dimension_semantics<parallel>, #tpu.dimension_semantics<arbitrary>], iteration_bounds = array<i64: 2, 1>, scalar_prefetch = 0 : i64, scratch_operands = 0 : i64, tpu.core_type = #tpu.core_type<tc>, window_params = [{transform_indices = @transform_0, window_bounds = array<i64: 1, 18, 18, 4>}, {pipeline_mode = #tpu.pipeline_mode<synchronous>, transform_indices = @transform_1, window_bounds = array<i64: 9, 4, 4>}, {pipeline_mode = #tpu.pipeline_mode<synchronous>, transform_indices = @transform_2, window_bounds = array<i64: 1, 4>}, {pipeline_mode = #tpu.pipeline_mode<synchronous>, transform_indices = @transform_3, window_bounds = array<i64: 2, 4, 16>}, {pipeline_mode = #tpu.pipeline_mode<synchronous>, transform_indices = @transform_4, window_bounds = array<i64: 1, 16>}, {transform_indices = @transform_5, window_bounds = array<i64: 1, 16, 2, 16, 16>}]} {
    %c16_i32 = arith.constant 16 : i32
    %0 = arith.muli %arg1, %c16_i32 : i32
    %1 = tpu.assume_multiple %0, 16 : i32
    %c0_i32 = arith.constant 0 : i32
    %2 = arith.addi %1, %c0_i32 : i32
    %c0 = arith.constant 0 : index
    %3 = arith.index_cast %2 : i32 to index
    %c0_0 = arith.constant 0 : index
    %c0_1 = arith.constant 0 : index
    %4 = vector.load %arg2[%c0, %3, %c0_0, %c0_1] : memref<1x18x18x4xf32, #tpu.memory_space<vmem>>, vector<1x16x16x4xf32>
    %5 = vector.shape_cast %4 : vector<1x16x16x4xf32> to vector<16x16x4xf32>
    %6 = vector.shape_cast %5 : vector<16x16x4xf32> to vector<256x4xf32>
    %c0_2 = arith.constant 0 : index
    %c0_3 = arith.constant 0 : index
    %c0_4 = arith.constant 0 : index
    %7 = vector.load %arg3[%c0_2, %c0_3, %c0_4] : memref<9x4x4xf32, #tpu.memory_space<vmem>>, vector<1x4x4xf32>
    %8 = vector.shape_cast %7 : vector<1x4x4xf32> to vector<4x4xf32>
    %cst = arith.constant dense<0.000000e+00> : vector<256x4xf32>
    %9 = tpu.matmul %6, %8, %cst {dimension_numbers = #tpu.dot_dimension_numbers<[1], [0], [0], [1], [0, 0, 1, 1], [], []>} : vector<256x4xf32>, vector<4x4xf32>, vector<256x4xf32> -> vector<256x4xf32>
    %c0_i32_5 = arith.constant 0 : i32
    %10 = arith.addi %1, %c0_i32_5 : i32
    %c0_6 = arith.constant 0 : index
    %11 = arith.index_cast %10 : i32 to index
    %c1 = arith.constant 1 : index
    %c0_7 = arith.constant 0 : index
    %12 = vector.load %arg2[%c0_6, %11, %c1, %c0_7] : memref<1x18x18x4xf32, #tpu.memory_space<vmem>>, vector<1x16x16x4xf32>
    %13 = vector.shape_cast %12 : vector<1x16x16x4xf32> to vector<16x16x4xf32>
    %14 = vector.shape_cast %13 : vector<16x16x4xf32> to vector<256x4xf32>
    %c1_8 = arith.constant 1 : index
    %c0_9 = arith.constant 0 : index
    %c0_10 = arith.constant 0 : index
    %15 = vector.load %arg3[%c1_8, %c0_9, %c0_10] : memref<9x4x4xf32, #tpu.memory_space<vmem>>, vector<1x4x4xf32>
    %16 = vector.shape_cast %15 : vector<1x4x4xf32> to vector<4x4xf32>
    %cst_11 = arith.constant dense<0.000000e+00> : vector<256x4xf32>
    %17 = tpu.matmul %14, %16, %cst_11 {dimension_numbers = #tpu.dot_dimension_numbers<[1], [0], [0], [1], [0, 0, 1, 1], [], []>} : vector<256x4xf32>, vector<4x4xf32>, vector<256x4xf32> -> vector<256x4xf32>
    %18 = arith.addf %9, %17 : vector<256x4xf32>
    %c0_i32_12 = arith.constant 0 : i32
    %19 = arith.addi %1, %c0_i32_12 : i32
    %c0_13 = arith.constant 0 : index
    %20 = arith.index_cast %19 : i32 to index
    %c2 = arith.constant 2 : index
    %c0_14 = arith.constant 0 : index
    %21 = vector.load %arg2[%c0_13, %20, %c2, %c0_14] : memref<1x18x18x4xf32, #tpu.memory_space<vmem>>, vector<1x16x16x4xf32>
    %22 = vector.shape_cast %21 : vector<1x16x16x4xf32> to vector<16x16x4xf32>
    %23 = vector.shape_cast %22 : vector<16x16x4xf32> to vector<256x4xf32>
    %c2_15 = arith.constant 2 : index
    %c0_16 = arith.constant 0 : index
    %c0_17 = arith.constant 0 : index
    %24 = vector.load %arg3[%c2_15, %c0_16, %c0_17] : memref<9x4x4xf32, #tpu.memory_space<vmem>>, vector<1x4x4xf32>
    %25 = vector.shape_cast %24 : vector<1x4x4xf32> to vector<4x4xf32>
    %cst_18 = arith.constant dense<0.000000e+00> : vector<256x4xf32>
    %26 = tpu.matmul %23, %25, %cst_18 {dimension_numbers = #tpu.dot_dimension_numbers<[1], [0], [0], [1], [0, 0, 1, 1], [], []>} : vector<256x4xf32>, vector<4x4xf32>, vector<256x4xf32> -> vector<256x4xf32>
    %27 = arith.addf %18, %26 : vector<256x4xf32>
    %c1_i32 = arith.constant 1 : i32
    %28 = arith.addi %1, %c1_i32 : i32
    %c0_19 = arith.constant 0 : index
    %29 = arith.index_cast %28 : i32 to index
    %c0_20 = arith.constant 0 : index
    %c0_21 = arith.constant 0 : index
    %30 = vector.load %arg2[%c0_19, %29, %c0_20, %c0_21] : memref<1x18x18x4xf32, #tpu.memory_space<vmem>>, vector<1x16x16x4xf32>
    %31 = vector.shape_cast %30 : vector<1x16x16x4xf32> to vector<16x16x4xf32>
    %32 = vector.shape_cast %31 : vector<16x16x4xf32> to vector<256x4xf32>
    %c3 = arith.constant 3 : index
    %c0_22 = arith.constant 0 : index
    %c0_23 = arith.constant 0 : index
    %33 = vector.load %arg3[%c3, %c0_22, %c0_23] : memref<9x4x4xf32, #tpu.memory_space<vmem>>, vector<1x4x4xf32>
    %34 = vector.shape_cast %33 : vector<1x4x4xf32> to vector<4x4xf32>
    %cst_24 = arith.constant dense<0.000000e+00> : vector<256x4xf32>
    %35 = tpu.matmul %32, %34, %cst_24 {dimension_numbers = #tpu.dot_dimension_numbers<[1], [0], [0], [1], [0, 0, 1, 1], [], []>} : vector<256x4xf32>, vector<4x4xf32>, vector<256x4xf32> -> vector<256x4xf32>
    %36 = arith.addf %27, %35 : vector<256x4xf32>
    %c1_i32_25 = arith.constant 1 : i32
    %37 = arith.addi %1, %c1_i32_25 : i32
    %c0_26 = arith.constant 0 : index
    %38 = arith.index_cast %37 : i32 to index
    %c1_27 = arith.constant 1 : index
    %c0_28 = arith.constant 0 : index
    %39 = vector.load %arg2[%c0_26, %38, %c1_27, %c0_28] : memref<1x18x18x4xf32, #tpu.memory_space<vmem>>, vector<1x16x16x4xf32>
    %40 = vector.shape_cast %39 : vector<1x16x16x4xf32> to vector<16x16x4xf32>
    %41 = vector.shape_cast %40 : vector<16x16x4xf32> to vector<256x4xf32>
    %c4 = arith.constant 4 : index
    %c0_29 = arith.constant 0 : index
    %c0_30 = arith.constant 0 : index
    %42 = vector.load %arg3[%c4, %c0_29, %c0_30] : memref<9x4x4xf32, #tpu.memory_space<vmem>>, vector<1x4x4xf32>
    %43 = vector.shape_cast %42 : vector<1x4x4xf32> to vector<4x4xf32>
    %cst_31 = arith.constant dense<0.000000e+00> : vector<256x4xf32>
    %44 = tpu.matmul %41, %43, %cst_31 {dimension_numbers = #tpu.dot_dimension_numbers<[1], [0], [0], [1], [0, 0, 1, 1], [], []>} : vector<256x4xf32>, vector<4x4xf32>, vector<256x4xf32> -> vector<256x4xf32>
    %45 = arith.addf %36, %44 : vector<256x4xf32>
    %c1_i32_32 = arith.constant 1 : i32
    %46 = arith.addi %1, %c1_i32_32 : i32
    %c0_33 = arith.constant 0 : index
    %47 = arith.index_cast %46 : i32 to index
    %c2_34 = arith.constant 2 : index
    %c0_35 = arith.constant 0 : index
    %48 = vector.load %arg2[%c0_33, %47, %c2_34, %c0_35] : memref<1x18x18x4xf32, #tpu.memory_space<vmem>>, vector<1x16x16x4xf32>
    %49 = vector.shape_cast %48 : vector<1x16x16x4xf32> to vector<16x16x4xf32>
    %50 = vector.shape_cast %49 : vector<16x16x4xf32> to vector<256x4xf32>
    %c5 = arith.constant 5 : index
    %c0_36 = arith.constant 0 : index
    %c0_37 = arith.constant 0 : index
    %51 = vector.load %arg3[%c5, %c0_36, %c0_37] : memref<9x4x4xf32, #tpu.memory_space<vmem>>, vector<1x4x4xf32>
    %52 = vector.shape_cast %51 : vector<1x4x4xf32> to vector<4x4xf32>
    %cst_38 = arith.constant dense<0.000000e+00> : vector<256x4xf32>
    %53 = tpu.matmul %50, %52, %cst_38 {dimension_numbers = #tpu.dot_dimension_numbers<[1], [0], [0], [1], [0, 0, 1, 1], [], []>} : vector<256x4xf32>, vector<4x4xf32>, vector<256x4xf32> -> vector<256x4xf32>
    %54 = arith.addf %45, %53 : vector<256x4xf32>
    %c2_i32 = arith.constant 2 : i32
    %55 = arith.addi %1, %c2_i32 : i32
    %c0_39 = arith.constant 0 : index
    %56 = arith.index_cast %55 : i32 to index
    %c0_40 = arith.constant 0 : index
    %c0_41 = arith.constant 0 : index
    %57 = vector.load %arg2[%c0_39, %56, %c0_40, %c0_41] : memref<1x18x18x4xf32, #tpu.memory_space<vmem>>, vector<1x16x16x4xf32>
    %58 = vector.shape_cast %57 : vector<1x16x16x4xf32> to vector<16x16x4xf32>
    %59 = vector.shape_cast %58 : vector<16x16x4xf32> to vector<256x4xf32>
    %c6 = arith.constant 6 : index
    %c0_42 = arith.constant 0 : index
    %c0_43 = arith.constant 0 : index
    %60 = vector.load %arg3[%c6, %c0_42, %c0_43] : memref<9x4x4xf32, #tpu.memory_space<vmem>>, vector<1x4x4xf32>
    %61 = vector.shape_cast %60 : vector<1x4x4xf32> to vector<4x4xf32>
    %cst_44 = arith.constant dense<0.000000e+00> : vector<256x4xf32>
    %62 = tpu.matmul %59, %61, %cst_44 {dimension_numbers = #tpu.dot_dimension_numbers<[1], [0], [0], [1], [0, 0, 1, 1], [], []>} : vector<256x4xf32>, vector<4x4xf32>, vector<256x4xf32> -> vector<256x4xf32>
    %63 = arith.addf %54, %62 : vector<256x4xf32>
    %c2_i32_45 = arith.constant 2 : i32
    %64 = arith.addi %1, %c2_i32_45 : i32
    %c0_46 = arith.constant 0 : index
    %65 = arith.index_cast %64 : i32 to index
    %c1_47 = arith.constant 1 : index
    %c0_48 = arith.constant 0 : index
    %66 = vector.load %arg2[%c0_46, %65, %c1_47, %c0_48] : memref<1x18x18x4xf32, #tpu.memory_space<vmem>>, vector<1x16x16x4xf32>
    %67 = vector.shape_cast %66 : vector<1x16x16x4xf32> to vector<16x16x4xf32>
    %68 = vector.shape_cast %67 : vector<16x16x4xf32> to vector<256x4xf32>
    %c7 = arith.constant 7 : index
    %c0_49 = arith.constant 0 : index
    %c0_50 = arith.constant 0 : index
    %69 = vector.load %arg3[%c7, %c0_49, %c0_50] : memref<9x4x4xf32, #tpu.memory_space<vmem>>, vector<1x4x4xf32>
    %70 = vector.shape_cast %69 : vector<1x4x4xf32> to vector<4x4xf32>
    %cst_51 = arith.constant dense<0.000000e+00> : vector<256x4xf32>
    %71 = tpu.matmul %68, %70, %cst_51 {dimension_numbers = #tpu.dot_dimension_numbers<[1], [0], [0], [1], [0, 0, 1, 1], [], []>} : vector<256x4xf32>, vector<4x4xf32>, vector<256x4xf32> -> vector<256x4xf32>
    %72 = arith.addf %63, %71 : vector<256x4xf32>
    %c2_i32_52 = arith.constant 2 : i32
    %73 = arith.addi %1, %c2_i32_52 : i32
    %c0_53 = arith.constant 0 : index
    %74 = arith.index_cast %73 : i32 to index
    %c2_54 = arith.constant 2 : index
    %c0_55 = arith.constant 0 : index
    %75 = vector.load %arg2[%c0_53, %74, %c2_54, %c0_55] : memref<1x18x18x4xf32, #tpu.memory_space<vmem>>, vector<1x16x16x4xf32>
    %76 = vector.shape_cast %75 : vector<1x16x16x4xf32> to vector<16x16x4xf32>
    %77 = vector.shape_cast %76 : vector<16x16x4xf32> to vector<256x4xf32>
    %c8 = arith.constant 8 : index
    %c0_56 = arith.constant 0 : index
    %c0_57 = arith.constant 0 : index
    %78 = vector.load %arg3[%c8, %c0_56, %c0_57] : memref<9x4x4xf32, #tpu.memory_space<vmem>>, vector<1x4x4xf32>
    %79 = vector.shape_cast %78 : vector<1x4x4xf32> to vector<4x4xf32>
    %cst_58 = arith.constant dense<0.000000e+00> : vector<256x4xf32>
    %80 = tpu.matmul %77, %79, %cst_58 {dimension_numbers = #tpu.dot_dimension_numbers<[1], [0], [0], [1], [0, 0, 1, 1], [], []>} : vector<256x4xf32>, vector<4x4xf32>, vector<256x4xf32> -> vector<256x4xf32>
    %81 = arith.addf %72, %80 : vector<256x4xf32>
    %c0_59 = arith.constant 0 : index
    %c0_60 = arith.constant 0 : index
    %82 = vector.load %arg4[%c0_59, %c0_60] : memref<1x4xf32, #tpu.memory_space<vmem>>, vector<1x4xf32>
    %83 = vector.broadcast %82 : vector<1x4xf32> to vector<256x4xf32>
    %84 = arith.addf %81, %83 : vector<256x4xf32>
    %cst_61 = arith.constant 0.000000e+00 : f32
    %85 = vector.broadcast %cst_61 : f32 to vector<256x4xf32>
    %86 = arith.maximumf %84, %85 : vector<256x4xf32>
    %c0_62 = arith.constant 0 : index
    %c0_63 = arith.constant 0 : index
    %c0_64 = arith.constant 0 : index
    %87 = vector.load %arg5[%c0_62, %c0_63, %c0_64] : memref<2x4x16xf32, #tpu.memory_space<vmem>>, vector<1x4x16xf32>
    %88 = vector.shape_cast %87 : vector<1x4x16xf32> to vector<4x16xf32>
    %cst_65 = arith.constant dense<0.000000e+00> : vector<256x16xf32>
    %89 = tpu.matmul %86, %88, %cst_65 {dimension_numbers = #tpu.dot_dimension_numbers<[1], [0], [0], [1], [0, 0, 1, 1], [], []>} : vector<256x4xf32>, vector<4x16xf32>, vector<256x16xf32> -> vector<256x16xf32>
    %c0_66 = arith.constant 0 : index
    %c0_67 = arith.constant 0 : index
    %90 = vector.load %arg6[%c0_66, %c0_67] : memref<1x16xf32, #tpu.memory_space<vmem>>, vector<1x16xf32>
    %91 = vector.broadcast %90 : vector<1x16xf32> to vector<256x16xf32>
    %92 = arith.addf %89, %91 : vector<256x16xf32>
    %93 = vector.shape_cast %92 : vector<256x16xf32> to vector<16x16x16xf32>
    %c0_68 = arith.constant 0 : index
    %c0_69 = arith.constant 0 : index
    %c0_70 = arith.constant 0 : index
    %c0_71 = arith.constant 0 : index
    %c0_72 = arith.constant 0 : index
    %94 = vector.load %arg7[%c0_68, %c0_69, %c0_70, %c0_71, %c0_72] : memref<1x16x2x16x16xf32, #tpu.memory_space<vmem>>, vector<1x16x1x16x16xf32>
    %95 = vector.shape_cast %94 : vector<1x16x1x16x16xf32> to vector<16x16x16xf32>
    %96 = vector.shape_cast %93 : vector<16x16x16xf32> to vector<1x16x1x16x16xf32>
    tpu.vector_store %arg7[%c0_68, %c0_69, %c0_70, %c0_71, %c0_72], %96 {strides = array<i32>} : memref<1x16x2x16x16xf32, #tpu.memory_space<vmem>>, vector<1x16x1x16x16xf32>,
    %c1_73 = arith.constant 1 : index
    %c0_74 = arith.constant 0 : index
    %c0_75 = arith.constant 0 : index
    %97 = vector.load %arg5[%c1_73, %c0_74, %c0_75] : memref<2x4x16xf32, #tpu.memory_space<vmem>>, vector<1x4x16xf32>
    %98 = vector.shape_cast %97 : vector<1x4x16xf32> to vector<4x16xf32>
    %cst_76 = arith.constant dense<0.000000e+00> : vector<256x16xf32>
    %99 = tpu.matmul %86, %98, %cst_76 {dimension_numbers = #tpu.dot_dimension_numbers<[1], [0], [0], [1], [0, 0, 1, 1], [], []>} : vector<256x4xf32>, vector<4x16xf32>, vector<256x16xf32> -> vector<256x16xf32>
    %c0_77 = arith.constant 0 : index
    %c0_78 = arith.constant 0 : index
    %100 = vector.load %arg6[%c0_77, %c0_78] : memref<1x16xf32, #tpu.memory_space<vmem>>, vector<1x16xf32>
    %101 = vector.broadcast %100 : vector<1x16xf32> to vector<256x16xf32>
    %102 = arith.addf %99, %101 : vector<256x16xf32>
    %103 = vector.shape_cast %102 : vector<256x16xf32> to vector<16x16x16xf32>
    %c0_79 = arith.constant 0 : index
    %c0_80 = arith.constant 0 : index
    %c1_81 = arith.constant 1 : index
    %c0_82 = arith.constant 0 : index
    %c0_83 = arith.constant 0 : index
    %104 = vector.load %arg7[%c0_79, %c0_80, %c1_81, %c0_82, %c0_83] : memref<1x16x2x16x16xf32, #tpu.memory_space<vmem>>, vector<1x16x1x16x16xf32>
    %105 = vector.shape_cast %104 : vector<1x16x1x16x16xf32> to vector<16x16x16xf32>
    %106 = vector.shape_cast %103 : vector<16x16x16xf32> to vector<1x16x1x16x16xf32>
    tpu.vector_store %arg7[%c0_79, %c0_80, %c1_81, %c0_82, %c0_83], %106 {strides = array<i32>} : memref<1x16x2x16x16xf32, #tpu.memory_space<vmem>>, vector<1x16x1x16x16xf32>,
    return
  }
  func.func @transform_0(%arg0: i32, %arg1: i32) -> (i32, i32, i32, i32) {
    %c0_i32 = arith.constant 0 : i32
    %c0_i32_0 = arith.constant 0 : i32
    %c0_i32_1 = arith.constant 0 : i32
    %c0_i32_2 = arith.constant 0 : i32
    return %arg0, %c0_i32, %c0_i32_0, %c0_i32_1 : i32, i32, i32, i32
  }
  func.func @transform_1(%arg0: i32, %arg1: i32) -> (i32, i32, i32) {
    %c0_i32 = arith.constant 0 : i32
    %c0_i32_0 = arith.constant 0 : i32
    %c0_i32_1 = arith.constant 0 : i32
    %c0_i32_2 = arith.constant 0 : i32
    return %c0_i32, %c0_i32_0, %c0_i32_1 : i32, i32, i32
  }
  func.func @transform_2(%arg0: i32, %arg1: i32) -> (i32, i32) {
    %c0_i32 = arith.constant 0 : i32
    %c0_i32_0 = arith.constant 0 : i32
    %c0_i32_1 = arith.constant 0 : i32
    return %c0_i32, %c0_i32_0 : i32, i32
  }
  func.func @transform_3(%arg0: i32, %arg1: i32) -> (i32, i32, i32) {
    %c0_i32 = arith.constant 0 : i32
    %c0_i32_0 = arith.constant 0 : i32
    %c0_i32_1 = arith.constant 0 : i32
    %c0_i32_2 = arith.constant 0 : i32
    return %c0_i32, %c0_i32_0, %c0_i32_1 : i32, i32, i32
  }
  func.func @transform_4(%arg0: i32, %arg1: i32) -> (i32, i32) {
    %c0_i32 = arith.constant 0 : i32
    %c0_i32_0 = arith.constant 0 : i32
    %c0_i32_1 = arith.constant 0 : i32
    return %c0_i32, %c0_i32_0 : i32, i32
  }
  func.func @transform_5(%arg0: i32, %arg1: i32) -> (i32, i32, i32, i32, i32) {
    %c0_i32 = arith.constant 0 : i32
    %c0_i32_0 = arith.constant 0 : i32
    %c0_i32_1 = arith.constant 0 : i32
    %c0_i32_2 = arith.constant 0 : i32
    return %arg0, %arg1, %c0_i32, %c0_i32_0, %c0_i32_1 : i32, i32, i32, i32, i32
  }
}

</mosaic_0001>

<bundles_post_ra>
// kernel: tile.8
= control target key start
LH: loop header
LB: loop body
LE: loop exit
PB: predicated region body
PF: predicated region fallthrough
CT: control target
= control target key end

     0   :  { %s22_s0 = inlined_call_operand.vmem [shape: f32[8], index: 0, kind: input, shape index: {}]   ;;  %s23_s1 = inlined_call_operand.vmem [shape: f32[2,8], index: 1, kind: output, shape index: {}]  }
   0x1   :  { %v4_v0 = vld [vmem:[%s22_s0] ss:$0 sm:$0xff] }
   0x2   :  { %5 = vst [vmem:[%s23_s1] sm:$0x3] %v4_v0 }

// kernel: tile.9
= control target key start
LH: loop header
LB: loop body
LE: loop exit
PB: predicated region body
PF: predicated region fallthrough
CT: control target
= control target key end

     0   :  { %vm7_vm0 = vcmask 64512   ;;  %vm13_vm1 = vcmask 130112   ;;  %s39_s0 = inlined_call_operand.vmem [shape: f32[2,8], index: 0, kind: input, shape index: {}]   ;;  %s40_s1 = inlined_call_operand.vmem [shape: f32[1,16], index: 1, kind: output, shape index: {}]  }
   0x1   :  { %v4_v0 = vld [vmem:[%s39_s0] sm:$0x3]  ;;  %s22_s0 = smov 8  }
   0x2   :  { %5 = vst [vmem:[#allocation1] sm:$0x3] %v4_v0 }
   0x9   :  { %v10_v1 = vld [vmem:[#allocation1 + $0x1] sm:$0x1]   ;;  %v6_v2 = vld [vmem:[#allocation1] sm:$0x1]  }
   0xa   :  { %11 = vrot.lane.b32.xlu0 %v10_v1, %s22_s0  ;;  %8 = vst.msk [vmem:[#allocation0] sm:$0x1] %vm7_vm0, %v6_v2  }
  0x7c   :  { %v12_v3 = vpop.permute.xlu0 %11  }
  0x7d   :  { %14 = vst.msk [vmem:[#allocation0] sm:$0x1] %vm13_vm1, %v12_v3  }
  0x84   :  { %v18_v4 = vld [vmem:[#allocation0] sm:$0x1] }
  0x85   :  { %20 = vst [vmem:[%s40_s1] sm:$0x1] %v18_v4 }

// kernel: bridge_up_forward.1
= control target key start
LH: loop header
LB: loop body
LE: loop exit
PB: predicated region body
PF: predicated region fallthrough
CT: control target
= control target key end

     0   :  { %s6369_s18 = smov 0   ;;  %s6371_s19 = smov 0   ;;  %s7886_s0 = inlined_call_operand.vmem [shape: f32[2,18,18,4], index: 0, kind: input, shape index: {}]   ;;  %s7887_s1 = inlined_call_operand.vmem [shape: f32[9,4,4], index: 1, kind: input, shape index: {}]   ;;  %s7888_s2 = inlined_call_operand.vmem [shape: f32[1,4], index: 2, kind: input, shape index: {}]   ;;  %s7889_s3 = inlined_call_operand.vmem [shape: f32[2,4,16], index: 3, kind: input, shape index: {}]   ;;  %s7890_s4 = inlined_call_operand.vmem [shape: f32[1,16], index: 4, kind: input, shape index: {}]   ;;  %s7891_s5 = inlined_call_operand.vmem [shape: f32[2,16,2,16,16], index: 5, kind: output, shape index: {}]  }
   0x1   :  { %s6373_s20 = smov 0  }
   0x2 LB: > { %s27_s21 = sadd.s32 1, %s6333_s19  ;;  %p4513_p0 = scmp.ge.s32.totalorder %s6337_s20, 1  ;;  %s6337_s20 = sphi %s6373_s20, %s15_s20   ;;  %s6333_s19 = sphi %s6371_s19, %s7979_s19   ;;  %s6329_s18 = sphi %s6369_s18, %s7978_s18  }
   0x3   : > { %p29_p1 = scmp.ge.s32.totalorder %s27_s21, 2  ;;  %p201_p2 = scmp.lt.s32.totalorder %s6337_s20, 3 }
   0x5   : > { %s7981_s21 = smov (%p29_p1, %s27_s21), 0  ;;  %p202_p3 = pnand %p4513_p0, %p201_p2 }
   0x7   : > { %205 = sbr.rel (%p202_p3) target bundleno = 870 (0x366), region = 40 }
   0xe   : > { %vm417_vm0 = vcmask 1043456   ;;  %v6390_v0 = vld [vmem:[%s7887_s1 + $0xc] sm:$0xf]  ;;  %v4517_v1 = vld [vmem:[%s7887_s1 + $0x4] sm:$0xf]  ;;  %p234_p4 = scmp.lt.s32.totalorder %s6329_s18, 1 }
   0xf   : > { %5632 = vmatprep.subr.msk.mxu0 %vm417_vm0, %v6390_v0  ;;  %5482 = vmatprep.subr.msk.mxu1 %vm417_vm0, %v4517_v1  ;;  %v4716_v2 = vld [vmem:[%s7887_s1 + $0x10] sm:$0xf]  ;;  %v285_v3 = vld [vmem:[%s7887_s1] sm:$0xf]  ;;  %vm320_vm1 = vcmask 31744   ;;  %vm4109_vm2 = vcmask 130048  }
  0x10   : > { %5633 = vmatpush3.msk.msra.mxu0 %vm417_vm0, %v6390_v0  ;;  %5483 = vmatpush3.msk.msra.mxu1 %vm417_vm0, %v4517_v1  ;;  %s7983_s18 = smov (!%p234_p4, %s6329_s18), 1  ;;  %v6420_v4 = vld [vmem:[%s7887_s1 + $0x14] sm:$0xf]  ;;  %v6465_v15 = vld [vmem:[%s7887_s1 + $0x8] sm:$0xf] }
  0x11   : > { %5682 = vmatprep.subr.msk.mxu0 %vm417_vm0, %v4716_v2  ;;  %5532 = vmatprep.subr.msk.mxu1 %vm417_vm0, %v285_v3  ;;  %s6290_s30 = smul.u32 432, %s7983_s18  ;;  %v6603_v41 = vld [vmem:[%s7887_s1 + $0x18] sm:$0xf]  ;;  %v6801_v63 = vld [vmem:[%s7887_s1 + $0x1c] sm:$0xf]  ;;  %s5118_s29 = sshll.u32 %s7983_s18, 9 }
  0x12   : > { %s7683_s9 = scalar_lea.vmem %s7891_s5, %s5118_s29 }
  0x13   : > { %s6415_s8 = scalar_lea.vmem %s7886_s0, %s6290_s30 }
  0x14   : > { %v286_v5 = vld [vmem:[%s6415_s8 + $0x1] sm:$0xff]  ;;  %v6424_v6 = vld [vmem:[%s6415_s8 + $0x18] sm:$0xff]  ;;  %v287_v7 = vld [vmem:[%s6415_s8 + $0x9] sm:$0xff] }
  0x15   : > { %5484 = vmatprep.mubr.msk.f32.mxu1 %vm320_vm1, %v286_v5  ;;  %5634 = vmatprep.mubr.msk.f32.mxu0 %vm320_vm1, %v6424_v6  ;;  %v6431_v8 = vld [vmem:[%s6415_s8 + $0x20] sm:$0xff]  ;;  %v6437_v10 = vld [vmem:[%s6415_s8 + $0x30] sm:$0xff]  ;;  %v6449_v12 = vld [vmem:[%s6415_s8 + $0x38] sm:$0xff] }
  0x16   : > { %v6434_v9 = vld [vmem:[%s6415_s8 + $0x19] sm:$0xff]  ;;  %5485 = vmatmul.mubr.msk.f32.vlgmr.msra.gmra.mrb[0].mxu1 %vm320_vm1, %v287_v7  ;;  %5635 = vmatmul.mubr.msk.f32.vlgmr.msra.gmra.mrb[0].mxu0 %vm320_vm1, %v6431_v8  ;;  %v6446_v11 = vld [vmem:[%s6415_s8 + $0x21] sm:$0xff]  ;;  %v6454_v13 = vld [vmem:[%s6415_s8 + $0x31] sm:$0xff] }
  0x17   : > { %5683 = vmatpush3.msk.msra.mxu0 %vm417_vm0, %v4716_v2  ;;  %5487 = vmatprep.mubr.msk.f32.mxu1 %vm320_vm1, %v6434_v9  ;;  %v6457_v14 = vld [vmem:[%s6415_s8 + $0x48] sm:$0xff]  ;;  %v6476_v16 = vld [vmem:[%s6415_s8 + $0x39] sm:$0xff]  ;;  %v6479_v17 = vld [vmem:[%s6415_s8 + $0x50] sm:$0xff] }
  0x18   : > { %5637 = vmatprep.mubr.msk.f32.mxu0 %vm320_vm1, %v6437_v10  ;;  %5732 = vmatprep.subr.msk.mxu0 %vm417_vm0, %v6420_v4  ;;  %v6482_v18 = vld [vmem:[%s6415_s8 + $0x49] sm:$0xff]  ;;  %v6485_v19 = vld [vmem:[%s6415_s8 + $0x60] sm:$0xff]  ;;  %v6498_v20 = vld [vmem:[%s6415_s8 + $0x51] sm:$0xff] }
  0x19   : > { %5533 = vmatpush3.msk.msra.mxu1 %vm417_vm0, %v285_v3  ;;  %v6501_v21 = vld [vmem:[%s6415_s8 + $0x68] sm:$0xff]  ;;  %v6507_v23 = vld [vmem:[%s6415_s8 + $0x78] sm:$0xff]  ;;  %v6521_v25 = vld [vmem:[%s6415_s8 + $0x80] sm:$0xff] }
  0x1a   : > { %5488 = vmatmul.mubr.msk.f32.gmra.mrb[2].mxu1 %vm320_vm1, %v6446_v11  ;;  %5638 = vmatmul.mubr.msk.f32.gmra.mrb[2].mxu0 %vm320_vm1, %v6449_v12  ;;  %v6504_v22 = vld [vmem:[%s6415_s8 + $0x61] sm:$0xff]  ;;  %v6518_v24 = vld [vmem:[%s6415_s8 + $0x69] sm:$0xff]  ;;  %v6524_v26 = vld [vmem:[%s6415_s8 + $0x79] sm:$0xff] }
  0x1b   : > { %5490 = vmatprep.mubr.msk.f32.mxu1 %vm320_vm1, %v6454_v13  ;;  %5640 = vmatprep.mubr.msk.f32.mxu0 %vm320_vm1, %v6457_v14  ;;  %v6527_v27 = vld [vmem:[%s6415_s8 + $0x90] sm:$0xff]  ;;  %v6538_v28 = vld [vmem:[%s6415_s8 + $0x81] sm:$0xff]  ;;  %v6541_v29 = vld [vmem:[%s6415_s8 + $0x98] sm:$0xff] }
  0x1c   : > { %5582 = vmatprep.subr.msk.mxu1 %vm417_vm0, %v6465_v15  ;;  %v6544_v30 = vld [vmem:[%s6415_s8 + $0x91] sm:$0xff]  ;;  %v6547_v31 = vld [vmem:[%s6415_s8 + $0xa8] sm:$0xff]  ;;  %v6558_v32 = vld [vmem:[%s6415_s8 + $0x99] sm:$0xff] }
  0x1d   : > { %v6561_v33 = vld [vmem:[%s6415_s8 + $0xb0] sm:$0xff]  ;;  %v6567_v35 = vld [vmem:[%s6415_s8 + $0xc0] sm:$0xff]  ;;  %v6581_v37 = vld [vmem:[%s6415_s8 + $0xc8] sm:$0xff] }
  0x1e   : > { %5491 = vmatmul.mubr.msk.f32.gmra.mrb[4].mxu1 %vm320_vm1, %v6476_v16  ;;  %5641 = vmatmul.mubr.msk.f32.gmra.mrb[4].mxu0 %vm320_vm1, %v6479_v17  ;;  %v6564_v34 = vld [vmem:[%s6415_s8 + $0xa9] sm:$0xff]  ;;  %v6578_v36 = vld [vmem:[%s6415_s8 + $0xb1] sm:$0xff]  ;;  %v6584_v38 = vld [vmem:[%s6415_s8 + $0xc1] sm:$0xff] }
  0x1f   : > { %5493 = vmatprep.mubr.msk.f32.mxu1 %vm320_vm1, %v6482_v18  ;;  %5643 = vmatprep.mubr.msk.f32.mxu0 %vm320_vm1, %v6485_v19  ;;  %7922 = vst [vmem:[#allocation2_spill] sm:$0xff] %v6584_v38  ;;  %v6595_v39 = vld [vmem:[%s6415_s8 + $0xc9] sm:$0xff]  ;;  %v6598_v40 = vld [vmem:[%s6415_s8 + $0xd9] sm:$0xff]  ;;  %v6614_v42 = vld [vmem:[%s6415_s8 + $0xe1] sm:$0xff] }
  0x20   : > { %7923 = vst [vmem:[#allocation3_spill] sm:$0xff] %v6595_v39  ;;  %7924 = vst [vmem:[#allocation4_spill] sm:$0xff] %v6598_v40  ;;  %v6619_v43 = vld [vmem:[%s6415_s8 + $0xf1] sm:$0xff]  ;;  %v6632_v44 = vld [vmem:[%s6415_s8 + $0xf9] sm:$0xff] }
  0x21   : > { %7925 = vst [vmem:[#allocation5_spill] sm:$0xff] %v6614_v42  ;;  %7926 = vst [vmem:[#allocation6_spill] sm:$0xff] %v6619_v43  ;;  %v6635_v45 = vld [vmem:[%s6415_s8 + $0x109] sm:$0xff]  ;;  %v6646_v46 = vld [vmem:[%s6415_s8 + $0x111] sm:$0xff] }
  0x22   : > { %5494 = vmatmul.mubr.msk.f32.gmra.mrb[6].mxu1 %vm320_vm1, %v6498_v20  ;;  %5644 = vmatmul.mubr.msk.f32.gmra.mrb[6].mxu0 %vm320_vm1, %v6501_v21  ;;  %7927 = vst [vmem:[#allocation7_spill] sm:$0xff] %v6632_v44  ;;  %7928 = vst [vmem:[#allocation8_spill] sm:$0xff] %v6635_v45  ;;  %v6649_v47 = vld [vmem:[%s6415_s8 + $0x121] sm:$0xff]  ;;  %v6660_v48 = vld [vmem:[%s6415_s8 + $0x129] sm:$0xff] }
  0x23   : > { %5496 = vmatprep.mubr.msk.f32.mxu1 %vm320_vm1, %v6504_v22  ;;  %5646 = vmatprep.mubr.msk.f32.mxu0 %vm320_vm1, %v6507_v23  ;;  %7929 = vst [vmem:[#allocation9_spill] sm:$0xff] %v6646_v46  ;;  %7930 = vst [vmem:[#allocation10_spill] sm:$0xff] %v6649_v47  ;;  %v6663_v49 = vld [vmem:[%s6415_s8 + $0x139] sm:$0xff]  ;;  %v6674_v50 = vld [vmem:[%s6415_s8 + $0x141] sm:$0xff] }
  0x24   : > { %7931 = vst [vmem:[#allocation11_spill] sm:$0xff] %v6660_v48  ;;  %7932 = vst [vmem:[#allocation12_spill] sm:$0xff] %v6663_v49  ;;  %v6677_v51 = vld [vmem:[%s6415_s8 + $0x151] sm:$0xff]  ;;  %v6688_v52 = vld [vmem:[%s6415_s8 + $0x159] sm:$0xff] }
  0x25   : > { %7933 = vst [vmem:[#allocation13_spill] sm:$0xff] %v6674_v50  ;;  %7934 = vst [vmem:[#allocation14_spill] sm:$0xff] %v6677_v51  ;;  %v6691_v53 = vld [vmem:[%s6415_s8 + $0x169] sm:$0xff]  ;;  %v6702_v54 = vld [vmem:[%s6415_s8 + $0x171] sm:$0xff] }
  0x26   : > { %5497 = vmatmul.mubr.msk.f32.gmra.mrb[8].mxu1 %vm320_vm1, %v6518_v24  ;;  %5647 = vmatmul.mubr.msk.f32.gmra.mrb[8].mxu0 %vm320_vm1, %v6521_v25  ;;  %7935 = vst [vmem:[#allocation15_spill] sm:$0xff] %v6688_v52  ;;  %7936 = vst [vmem:[#allocation16_spill] sm:$0xff] %v6691_v53  ;;  %v253_v55 = vld [vmem:[%s6415_s8] sm:$0xff]  ;;  %v254_v56 = vld [vmem:[%s6415_s8 + $0x8] sm:$0xff] }
  0x27   : > { %5499 = vmatprep.mubr.msk.f32.mxu1 %vm320_vm1, %v6524_v26  ;;  %5649 = vmatprep.mubr.msk.f32.mxu0 %vm320_vm1, %v6527_v27  ;;  %7937 = vst [vmem:[#allocation17_spill] sm:$0xff] %v6702_v54  ;;  %v6765_v57 = vld [vmem:[%s6415_s8 + $0x181] sm:$0xff]  ;;  %v6776_v58 = vld [vmem:[%s6415_s8 + $0x189] sm:$0xff]  ;;  %v6793_v61 = vld [vmem:[%s6415_s8 + $0xd8] sm:$0xff] }
  0x28   : > { %7938 = vst [vmem:[#allocation18_spill] sm:$0xff] %v6765_v57  ;;  %7939 = vst [vmem:[#allocation19_spill] sm:$0xff] %v6776_v58  ;;  %v6779_v59 = vld [vmem:[%s6415_s8 + $0x1a] sm:$0xff]  ;;  %v6790_v60 = vld [vmem:[%s6415_s8 + $0x22] sm:$0xff] }
  0x29   : > { %v6796_v62 = vld [vmem:[%s6415_s8 + $0x32] sm:$0xff]  ;;  %v6812_v1 = vld [vmem:[%s6415_s8 + $0xe0] sm:$0xff]  ;;  %v6842_v7 = vld [vmem:[%s6415_s8 + $0x108] sm:$0xff] }
  0x2a   : > { %5500 = vmatmul.mubr.msk.f32.gmra.mrb[10].mxu1 %vm320_vm1, %v6538_v28  ;;  %5650 = vmatmul.mubr.msk.f32.gmra.mrb[10].mxu0 %vm320_vm1, %v6541_v29  ;;  %v6815_v2 = vld [vmem:[%s6415_s8 + $0x3a] sm:$0xff]  ;;  %v6820_v3 = vld [vmem:[%s6415_s8 + $0xf0] sm:$0xff] }
  0x2b   : > { %5502 = vmatprep.mubr.msk.f32.mxu1 %vm320_vm1, %v6544_v30  ;;  %5652 = vmatprep.mubr.msk.f32.mxu0 %vm320_vm1, %v6547_v31  ;;  %7940 = vst [vmem:[#allocation20_spill] sm:$0xff] %v6815_v2  ;;  %v6836_v5 = vld [vmem:[%s6415_s8 + $0xf8] sm:$0xff] }
  0x2e   : > { %5503 = vmatmul.mubr.msk.f32.gmra.mrb[12].mxu1 %vm320_vm1, %v6558_v32  ;;  %5653 = vmatmul.mubr.msk.f32.gmra.mrb[12].mxu0 %vm320_vm1, %v6561_v33 }
  0x2f   : > { %5505 = vmatprep.mubr.msk.f32.mxu1 %vm320_vm1, %v6564_v34  ;;  %5655 = vmatprep.mubr.msk.f32.mxu0 %vm320_vm1, %v6567_v35 }
  0x32   : > { %5506 = vmatmul.mubr.msk.f32.gmra.mrb[14].mxu1 %vm320_vm1, %v6578_v36  ;;  %5656 = vmatmul.mubr.msk.f32.gmra.mrb[14].mxu0 %vm320_vm1, %v6581_v37 }
  0x33   : > { %5508 = vmatprep.mubr.msk.f32.mxu1 %vm320_vm1, %v6584_v38  ;;  %5684 = vmatprep.mubr.msk.f32.mxu0 %vm320_vm1, %v6434_v9  ;;  %v6856_v9 = vld [vmem:[%s6415_s8 + $0x110] sm:$0xff] }
  0x36   : > { %5509 = vmatmul.mubr.msk.f32.gmra.mrb[16].mxu1 %vm320_vm1, %v6595_v39  ;;  %5685 = vmatmul.mubr.msk.f32.vlgmr.msra.gmra.mrb[0].mxu0 %vm320_vm1, %v6446_v11  ;;  %v6859_v11 = vld [vmem:[%s6415_s8 + $0x6a] sm:$0xff] }
  0x37   : > { %5733 = vmatpush3.msk.msra.mxu0 %vm417_vm0, %v6420_v4  ;;  %5511 = vmatprep.mubr.msk.f32.mxu1 %vm320_vm1, %v6598_v40  ;;  %v6823_v4 = vld [vmem:[%s6415_s8 + $0x4a] sm:$0xff]  ;;  %7944 = vst [vmem:[#allocation24_spill] sm:$0xff] %v6859_v11 }
  0x38   : > { %5687 = vmatprep.mubr.msk.f32.mxu0 %vm320_vm1, %v6454_v13  ;;  %5782 = vmatprep.subr.msk.mxu0 %vm417_vm0, %v6603_v41  ;;  %7941 = vst [vmem:[#allocation21_spill] sm:$0xff] %v6823_v4 }
  0x3a   : > { %5512 = vmatmul.mubr.msk.f32.gmra.mrb[18].mxu1 %vm320_vm1, %v6614_v42  ;;  %5688 = vmatmul.mubr.msk.f32.gmra.mrb[2].mxu0 %vm320_vm1, %v6476_v16 }
  0x3b   : > { %5514 = vmatprep.mubr.msk.f32.mxu1 %vm320_vm1, %v6619_v43  ;;  %5690 = vmatprep.mubr.msk.f32.mxu0 %vm320_vm1, %v6482_v18 }
  0x3e   : > { %5515 = vmatmul.mubr.msk.f32.gmra.mrb[20].mxu1 %vm320_vm1, %v6632_v44  ;;  %5691 = vmatmul.mubr.msk.f32.gmra.mrb[4].mxu0 %vm320_vm1, %v6498_v20 }
  0x3f   : > { %5517 = vmatprep.mubr.msk.f32.mxu1 %vm320_vm1, %v6635_v45  ;;  %5693 = vmatprep.mubr.msk.f32.mxu0 %vm320_vm1, %v6504_v22 }
  0x42   : > { %5518 = vmatmul.mubr.msk.f32.gmra.mrb[22].mxu1 %vm320_vm1, %v6646_v46  ;;  %5694 = vmatmul.mubr.msk.f32.gmra.mrb[6].mxu0 %vm320_vm1, %v6518_v24 }
  0x43   : > { %5520 = vmatprep.mubr.msk.f32.mxu1 %vm320_vm1, %v6649_v47  ;;  %5696 = vmatprep.mubr.msk.f32.mxu0 %vm320_vm1, %v6524_v26 }
  0x46   : > { %5521 = vmatmul.mubr.msk.f32.gmra.mrb[24].mxu1 %vm320_vm1, %v6660_v48  ;;  %5697 = vmatmul.mubr.msk.f32.gmra.mrb[8].mxu0 %vm320_vm1, %v6538_v28 }
  0x47   : > { %5523 = vmatprep.mubr.msk.f32.mxu1 %vm320_vm1, %v6663_v49  ;;  %5699 = vmatprep.mubr.msk.f32.mxu0 %vm320_vm1, %v6544_v30 }
  0x4a   : > { %5524 = vmatmul.mubr.msk.f32.gmra.mrb[26].mxu1 %vm320_vm1, %v6674_v50  ;;  %5700 = vmatmul.mubr.msk.f32.gmra.mrb[10].mxu0 %vm320_vm1, %v6558_v32 }
  0x4b   : > { %5526 = vmatprep.mubr.msk.f32.mxu1 %vm320_vm1, %v6677_v51  ;;  %5702 = vmatprep.mubr.msk.f32.mxu0 %vm320_vm1, %v6564_v34 }
  0x4e   : > { %5527 = vmatmul.mubr.msk.f32.gmra.mrb[28].mxu1 %vm320_vm1, %v6688_v52  ;;  %5703 = vmatmul.mubr.msk.f32.gmra.mrb[12].mxu0 %vm320_vm1, %v6578_v36 }
  0x4f   : > { %5529 = vmatprep.mubr.msk.f32.mxu1 %vm320_vm1, %v6691_v53  ;;  %5705 = vmatprep.mubr.msk.f32.mxu0 %vm320_vm1, %v6584_v38  ;;  %v6970_v38 = vld [vmem:[%s6415_s8 + $0x10a] sm:$0xff] }
  0x52   : > { %5530 = vmatmul.mubr.msk.f32.gmra.mrb[30].mxu1 %vm320_vm1, %v6702_v54  ;;  %5706 = vmatmul.mubr.msk.f32.gmra.mrb[14].mxu0 %vm320_vm1, %v6595_v39  ;;  %v6957_v39 = vld [vmem:[%s6415_s8 + $0xf2] sm:$0xff] }
  0x53   : > { %5534 = vmatprep.mubr.msk.f32.mxu1 %vm320_vm1, %v253_v55  ;;  %5708 = vmatprep.mubr.msk.f32.mxu0 %vm320_vm1, %v6598_v40  ;;  %v6876_v55 = vld [vmem:[%s6415_s8 + $0x128] sm:$0xff] }
  0x54   : > { %v6954_v40 = vld [vmem:[%s6415_s8 + $0xe2] sm:$0xff] }
  0x56   : > { %5535 = vmatmul.mubr.msk.f32.vlgmr.msra.gmra.mrb[0].mxu1 %vm320_vm1, %v254_v56  ;;  %5709 = vmatmul.mubr.msk.f32.gmra.mrb[16].mxu0 %vm320_vm1, %v6614_v42  ;;  %v6879_v56 = vld [vmem:[%s6415_s8 + $0x82] sm:$0xff]  ;;  %v971_v42 = vld [vmem:[%s6415_s8 + $0xa] sm:$0xff] }
  0x57   : > { %5537 = vmatprep.mubr.msk.f32.mxu1 %vm320_vm1, %v6424_v6  ;;  %5711 = vmatprep.mubr.msk.f32.mxu0 %vm320_vm1, %v6619_v43  ;;  %v6839_v6 = vld [vmem:[%s6415_s8 + $0x52] sm:$0xff]  ;;  %v6943_v43 = vld [vmem:[%s6415_s8 + $0xda] sm:$0xff] }
  0x58   : > { %5583 = vmatpush3.msk.msra.mxu1 %vm417_vm0, %v6465_v15  ;;  %7942 = vst [vmem:[#allocation22_spill] sm:$0xff] %v6839_v6  ;;  %v6862_v15 = vld [vmem:[%s6415_s8 + $0x120] sm:$0xff] }
  0x59   : > { %6032 = vmatprep.subr.msk.mxu1 %vm417_vm0, %v6390_v0 }
  0x5a   : > { %5538 = vmatmul.mubr.msk.f32.gmra.mrb[2].mxu1 %vm320_vm1, %v6431_v8  ;;  %5712 = vmatmul.mubr.msk.f32.gmra.mrb[18].mxu0 %vm320_vm1, %v6632_v44  ;;  %v6845_v8 = vld [vmem:[%s6415_s8 + $0x62] sm:$0xff] }
  0x5b   : > { %5540 = vmatprep.mubr.msk.f32.mxu1 %vm320_vm1, %v6437_v10  ;;  %5714 = vmatprep.mubr.msk.f32.mxu0 %vm320_vm1, %v6635_v45  ;;  %7943 = vst [vmem:[#allocation23_spill] sm:$0xff] %v6845_v8  ;;  %v6939_v45 = vld [vmem:[%s6415_s8 + $0xca] sm:$0xff]  ;;  %v970_v44 = vld [vmem:[%s6415_s8 + $0x2] sm:$0xff] }
  0x5e   : > { %5541 = vmatmul.mubr.msk.f32.gmra.mrb[4].mxu1 %vm320_vm1, %v6449_v12  ;;  %5715 = vmatmul.mubr.msk.f32.gmra.mrb[20].mxu0 %vm320_vm1, %v6646_v46  ;;  %v6936_v46 = vld [vmem:[%s6415_s8 + $0x170] sm:$0xff] }
  0x5f   : > { %5543 = vmatprep.mubr.msk.f32.mxu1 %vm320_vm1, %v6457_v14  ;;  %5717 = vmatprep.mubr.msk.f32.mxu0 %vm320_vm1, %v6649_v47  ;;  %v6925_v47 = vld [vmem:[%s6415_s8 + $0xc2] sm:$0xff] }
  0x62   : > { %5544 = vmatmul.mubr.msk.f32.gmra.mrb[6].mxu1 %vm320_vm1, %v6479_v17  ;;  %5718 = vmatmul.mubr.msk.f32.gmra.mrb[22].mxu0 %vm320_vm1, %v6660_v48  ;;  %v6922_v48 = vld [vmem:[%s6415_s8 + $0x168] sm:$0xff] }
  0x63   : > { %5546 = vmatprep.mubr.msk.f32.mxu1 %vm320_vm1, %v6485_v19  ;;  %5720 = vmatprep.mubr.msk.f32.mxu0 %vm320_vm1, %v6663_v49  ;;  %v6919_v49 = vld [vmem:[%s6415_s8 + $0xb2] sm:$0xff] }
  0x66   : > { %5547 = vmatmul.mubr.msk.f32.gmra.mrb[8].mxu1 %vm320_vm1, %v6501_v21  ;;  %5721 = vmatmul.mubr.msk.f32.gmra.mrb[24].mxu0 %vm320_vm1, %v6674_v50  ;;  %v6916_v50 = vld [vmem:[%s6415_s8 + $0x158] sm:$0xff] }
  0x67   : > { %5549 = vmatprep.mubr.msk.f32.mxu1 %vm320_vm1, %v6507_v23  ;;  %5723 = vmatprep.mubr.msk.f32.mxu0 %vm320_vm1, %v6677_v51  ;;  %v6905_v51 = vld [vmem:[%s6415_s8 + $0xaa] sm:$0xff] }
  0x68   : > { %7947 = vst [vmem:[#allocation27_spill] sm:$0xff] %v6905_v51 }
  0x6a   : > { %5550 = vmatmul.mubr.msk.f32.gmra.mrb[10].mxu1 %vm320_vm1, %v6521_v25  ;;  %5724 = vmatmul.mubr.msk.f32.gmra.mrb[26].mxu0 %vm320_vm1, %v6688_v52  ;;  %v6902_v52 = vld [vmem:[%s6415_s8 + $0x150] sm:$0xff] }
  0x6b   : > { %5552 = vmatprep.mubr.msk.f32.mxu1 %vm320_vm1, %v6527_v27  ;;  %5726 = vmatprep.mubr.msk.f32.mxu0 %vm320_vm1, %v6691_v53  ;;  %v6899_v53 = vld [vmem:[%s6415_s8 + $0x9a] sm:$0xff] }
  0x6e   : > { %5553 = vmatmul.mubr.msk.f32.gmra.mrb[12].mxu1 %vm320_vm1, %v6541_v29  ;;  %5727 = vmatmul.mubr.msk.f32.gmra.mrb[28].mxu0 %vm320_vm1, %v6702_v54  ;;  %v6896_v54 = vld [vmem:[%s6415_s8 + $0x140] sm:$0xff] }
  0x6f   : > { %5555 = vmatprep.mubr.msk.f32.mxu1 %vm320_vm1, %v6547_v31  ;;  %5729 = vmatprep.mubr.msk.f32.mxu0 %vm320_vm1, %v6765_v57  ;;  %v6885_v57 = vld [vmem:[%s6415_s8 + $0x92] sm:$0xff] }
  0x70   : > { %7946 = vst [vmem:[#allocation26_spill] sm:$0xff] %v6885_v57 }
  0x72   : > { %5556 = vmatmul.mubr.msk.f32.gmra.mrb[14].mxu1 %vm320_vm1, %v6561_v33  ;;  %5730 = vmatmul.mubr.msk.f32.gmra.mrb[30].mxu0 %vm320_vm1, %v6776_v58  ;;  %v6882_v58 = vld [vmem:[%s6415_s8 + $0x138] sm:$0xff] }
  0x73   : > { %5558 = vmatprep.mubr.msk.f32.mxu1 %vm320_vm1, %v6567_v35  ;;  %5734 = vmatprep.mubr.msk.f32.mxu0 %vm320_vm1, %v6779_v59 }
  0x76   : > { %5559 = vmatmul.mubr.msk.f32.gmra.mrb[16].mxu1 %vm320_vm1, %v6581_v37  ;;  %5735 = vmatmul.mubr.msk.f32.vlgmr.msra.gmra.mrb[0].mxu0 %vm320_vm1, %v6790_v60 }
  0x77   : > { %5783 = vmatpush3.msk.msra.mxu0 %vm417_vm0, %v6603_v41  ;;  %5561 = vmatprep.mubr.msk.f32.mxu1 %vm320_vm1, %v6793_v61  ;;  %v6865_v41 = vld [vmem:[%s6415_s8 + $0x7a] sm:$0xff] }
  0x78   : > { %5737 = vmatprep.mubr.msk.f32.mxu0 %vm320_vm1, %v6796_v62  ;;  %5832 = vmatprep.subr.msk.mxu0 %vm417_vm0, %v6801_v63  ;;  %7945 = vst [vmem:[#allocation25_spill] sm:$0xff] %v6865_v41 }
  0x7a   : > { %5562 = vmatmul.mubr.msk.f32.gmra.mrb[18].mxu1 %vm320_vm1, %v6812_v1  ;;  %5738 = vmatmul.mubr.msk.f32.gmra.mrb[2].mxu0 %vm320_vm1, %v6815_v2 }
  0x7b   : > { %5564 = vmatprep.mubr.msk.f32.mxu1 %vm320_vm1, %v6820_v3  ;;  %5740 = vmatprep.mubr.msk.f32.mxu0 %vm320_vm1, %v6823_v4 }
  0x7e   : > { %5565 = vmatmul.mubr.msk.f32.gmra.mrb[20].mxu1 %vm320_vm1, %v6836_v5  ;;  %5741 = vmatmul.mubr.msk.f32.gmra.mrb[4].mxu0 %vm320_vm1, %v6839_v6 }
  0x7f   : > { %5567 = vmatprep.mubr.msk.f32.mxu1 %vm320_vm1, %v6842_v7  ;;  %5743 = vmatprep.mubr.msk.f32.mxu0 %vm320_vm1, %v6845_v8 }
  0x82   : > { %5568 = vmatmul.mubr.msk.f32.gmra.mrb[22].mxu1 %vm320_vm1, %v6856_v9  ;;  %5744 = vmatmul.mubr.msk.f32.gmra.mrb[6].mxu0 %vm320_vm1, %v6859_v11 }
  0x83   : > { %5570 = vmatprep.mubr.msk.f32.mxu1 %vm320_vm1, %v6862_v15  ;;  %5746 = vmatprep.mubr.msk.f32.mxu0 %vm320_vm1, %v6865_v41 }
  0x86   : > { %5571 = vmatmul.mubr.msk.f32.gmra.mrb[24].mxu1 %vm320_vm1, %v6876_v55  ;;  %5747 = vmatmul.mubr.msk.f32.gmra.mrb[8].mxu0 %vm320_vm1, %v6879_v56 }
  0x87   : > { %5573 = vmatprep.mubr.msk.f32.mxu1 %vm320_vm1, %v6882_v58  ;;  %5749 = vmatprep.mubr.msk.f32.mxu0 %vm320_vm1, %v6885_v57 }
  0x8a   : > { %5574 = vmatmul.mubr.msk.f32.gmra.mrb[26].mxu1 %vm320_vm1, %v6896_v54  ;;  %5750 = vmatmul.mubr.msk.f32.gmra.mrb[10].mxu0 %vm320_vm1, %v6899_v53 }
  0x8b   : > { %5576 = vmatprep.mubr.msk.f32.mxu1 %vm320_vm1, %v6902_v52  ;;  %5752 = vmatprep.mubr.msk.f32.mxu0 %vm320_vm1, %v6905_v51 }
  0x8e   : > { %5577 = vmatmul.mubr.msk.f32.gmra.mrb[28].mxu1 %vm320_vm1, %v6916_v50  ;;  %5753 = vmatmul.mubr.msk.f32.gmra.mrb[12].mxu0 %vm320_vm1, %v6919_v49 }
  0x8f   : > { %5579 = vmatprep.mubr.msk.f32.mxu1 %vm320_vm1, %v6922_v48  ;;  %5755 = vmatprep.mubr.msk.f32.mxu0 %vm320_vm1, %v6925_v47 }
  0x92   : > { %5580 = vmatmul.mubr.msk.f32.gmra.mrb[30].mxu1 %vm320_vm1, %v6936_v46  ;;  %5756 = vmatmul.mubr.msk.f32.gmra.mrb[14].mxu0 %vm320_vm1, %v6939_v45 }
  0x93   : > { %5584 = vmatprep.mubr.msk.f32.mxu1 %vm320_vm1, %v970_v44  ;;  %5758 = vmatprep.mubr.msk.f32.mxu0 %vm320_vm1, %v6943_v43  ;;  %v6967_v44 = vld [vmem:[%s6415_s8 + $0xfa] sm:$0xff] }
  0x96   : > { %5585 = vmatmul.mubr.msk.f32.vlgmr.msra.gmra.mrb[0].mxu1 %vm320_vm1, %v971_v42  ;;  %5759 = vmatmul.mubr.msk.f32.gmra.mrb[16].mxu0 %vm320_vm1, %v6954_v40  ;;  %v6983_v42 = vld [vmem:[%s6415_s8 + $0x112] sm:$0xff] }
  0x97   : > { %5587 = vmatprep.mubr.msk.f32.mxu1 %vm320_vm1, %v6779_v59  ;;  %5761 = vmatprep.mubr.msk.f32.mxu0 %vm320_vm1, %v6957_v39  ;;  %v6986_v59 = vld [vmem:[%s6415_s8 + $0x122] sm:$0xff] }
  0x98   : > { %6033 = vmatpush3.msk.msra.mxu1 %vm417_vm0, %v6390_v0  ;;  %v6997_v0 = vld [vmem:[%s6415_s8 + $0x12a] sm:$0xff] }
  0x9a   : > { %5588 = vmatmul.mubr.msk.f32.gmra.mrb[2].mxu1 %vm320_vm1, %v6790_v60  ;;  %5762 = vmatmul.mubr.msk.f32.gmra.mrb[18].mxu0 %vm320_vm1, %v6967_v44  ;;  %v7000_v60 = vld [vmem:[%s6415_s8 + $0x13a] sm:$0xff] }
  0x9b   : > { %5590 = vmatprep.mubr.msk.f32.mxu1 %vm320_vm1, %v6796_v62  ;;  %5764 = vmatprep.mubr.msk.f32.mxu0 %vm320_vm1, %v6970_v38 }
  0x9e   : > { %5591 = vmatmul.mubr.msk.f32.gmra.mrb[4].mxu1 %vm320_vm1, %v6815_v2  ;;  %5765 = vmatmul.mubr.msk.f32.gmra.mrb[20].mxu0 %vm320_vm1, %v6983_v42  ;;  %v7014_v2 = vld [vmem:[%s6415_s8 + $0x152] sm:$0xff] }
  0x9f   : > { %5593 = vmatprep.mubr.msk.f32.mxu1 %vm320_vm1, %v6823_v4  ;;  %5767 = vmatprep.mubr.msk.f32.mxu0 %vm320_vm1, %v6986_v59  ;;  %v7011_v4 = vld [vmem:[%s6415_s8 + $0x142] sm:$0xff] }
  0xa2   : > { %5594 = vmatmul.mubr.msk.f32.gmra.mrb[6].mxu1 %vm320_vm1, %v6839_v6  ;;  %5768 = vmatmul.mubr.msk.f32.gmra.mrb[22].mxu0 %vm320_vm1, %v6997_v0  ;;  %v7028_v6 = vld [vmem:[%s6415_s8 + $0x16a] sm:$0xff] }
  0xa3   : > { %5596 = vmatprep.mubr.msk.f32.mxu1 %vm320_vm1, %v6845_v8  ;;  %5770 = vmatprep.mubr.msk.f32.mxu0 %vm320_vm1, %v7000_v60  ;;  %v7025_v8 = vld [vmem:[%s6415_s8 + $0x15a] sm:$0xff] }
  0xa6   : > { %5597 = vmatmul.mubr.msk.f32.gmra.mrb[8].mxu1 %vm320_vm1, %v6859_v11  ;;  %5771 = vmatmul.mubr.msk.f32.gmra.mrb[24].mxu0 %vm320_vm1, %v7011_v4  ;;  %v7042_v11 = vld [vmem:[%s6415_s8 + $0x182] sm:$0xff] }
  0xa7   : > { %5599 = vmatprep.mubr.msk.f32.mxu1 %vm320_vm1, %v6865_v41  ;;  %5773 = vmatprep.mubr.msk.f32.mxu0 %vm320_vm1, %v7014_v2  ;;  %v7039_v41 = vld [vmem:[%s6415_s8 + $0x172] sm:$0xff] }
  0xaa   : > { %5600 = vmatmul.mubr.msk.f32.gmra.mrb[10].mxu1 %vm320_vm1, %v6879_v56  ;;  %5774 = vmatmul.mubr.msk.f32.gmra.mrb[26].mxu0 %vm320_vm1, %v7025_v8 }
  0xab   : > { %5602 = vmatprep.mubr.msk.f32.mxu1 %vm320_vm1, %v6885_v57  ;;  %5776 = vmatprep.mubr.msk.f32.mxu0 %vm320_vm1, %v7028_v6  ;;  %v7053_v57 = vld [vmem:[%s6415_s8 + $0x18a] sm:$0xff] }
  0xae   : > { %5603 = vmatmul.mubr.msk.f32.gmra.mrb[12].mxu1 %vm320_vm1, %v6899_v53  ;;  %5777 = vmatmul.mubr.msk.f32.gmra.mrb[28].mxu0 %vm320_vm1, %v7039_v41 }
  0xaf   : > { %5605 = vmatprep.mubr.msk.f32.mxu1 %vm320_vm1, %v6905_v51  ;;  %5779 = vmatprep.mubr.msk.f32.mxu0 %vm320_vm1, %v7042_v11  ;;  %v7066_v51 = vld [vmem:[%s7887_s1 + $0x20] sm:$0xf] }
  0xb2   : > { %5606 = vmatmul.mubr.msk.f32.gmra.mrb[14].mxu1 %vm320_vm1, %v6919_v49  ;;  %5780 = vmatmul.mubr.msk.f32.gmra.mrb[30].mxu0 %vm320_vm1, %v7053_v57 }
  0xb3   : > { %5608 = vmatprep.mubr.msk.f32.mxu1 %vm320_vm1, %v6925_v47  ;;  %5784 = vmatprep.mubr.msk.f32.mxu0 %vm320_vm1, %v6437_v10  ;;  %v4844_v10 = vld [vmem:[%s6415_s8 + $0x180] sm:$0xff] }
  0xb6   : > { %5609 = vmatmul.mubr.msk.f32.gmra.mrb[16].mxu1 %vm320_vm1, %v6939_v45  ;;  %5785 = vmatmul.mubr.msk.f32.vlgmr.msra.gmra.mrb[0].mxu0 %vm320_vm1, %v6449_v12  ;;  %v4845_v12 = vld [vmem:[%s6415_s8 + $0x188] sm:$0xff] }
  0xb7   : > { %5833 = vmatpush3.msk.msra.mxu0 %vm417_vm0, %v6801_v63  ;;  %5611 = vmatprep.mubr.msk.f32.mxu1 %vm320_vm1, %v6943_v43 }
  0xb8   : > { %5787 = vmatprep.mubr.msk.f32.mxu0 %vm320_vm1, %v6457_v14  ;;  %5882 = vmatprep.subr.msk.mxu0 %vm417_vm0, %v7066_v51  ;;  %v4846_v14 = vld [vmem:[%s6415_s8 + $0x198] sm:$0xff] }
  0xba   : > { %5612 = vmatmul.mubr.msk.f32.gmra.mrb[18].mxu1 %vm320_vm1, %v6954_v40  ;;  %5788 = vmatmul.mubr.msk.f32.gmra.mrb[2].mxu0 %vm320_vm1, %v6479_v17  ;;  %v4847_v17 = vld [vmem:[%s6415_s8 + $0x1a0] sm:$0xff] }
  0xbb   : > { %5614 = vmatprep.mubr.msk.f32.mxu1 %vm320_vm1, %v6957_v39  ;;  %5790 = vmatprep.mubr.msk.f32.mxu0 %vm320_vm1, %v6485_v19  ;;  %v7951_v19 = vld [vmem:[#allocation5_spill] sm:$0xff] }
  0xbe   : > { %5615 = vmatmul.mubr.msk.f32.gmra.mrb[20].mxu1 %vm320_vm1, %v6967_v44  ;;  %5791 = vmatmul.mubr.msk.f32.gmra.mrb[4].mxu0 %vm320_vm1, %v6501_v21  ;;  %v7953_v21 = vld [vmem:[#allocation7_spill] sm:$0xff] }
  0xbf   : > { %5617 = vmatprep.mubr.msk.f32.mxu1 %vm320_vm1, %v6970_v38  ;;  %5793 = vmatprep.mubr.msk.f32.mxu0 %vm320_vm1, %v6507_v23  ;;  %v7955_v23 = vld [vmem:[#allocation9_spill] sm:$0xff] }
  0xc2   : > { %5618 = vmatmul.mubr.msk.f32.gmra.mrb[22].mxu1 %vm320_vm1, %v6983_v42  ;;  %5794 = vmatmul.mubr.msk.f32.gmra.mrb[6].mxu0 %vm320_vm1, %v6521_v25  ;;  %v7957_v25 = vld [vmem:[#allocation11_spill] sm:$0xff] }
  0xc3   : > { %5620 = vmatprep.mubr.msk.f32.mxu1 %vm320_vm1, %v6986_v59  ;;  %5796 = vmatprep.mubr.msk.f32.mxu0 %vm320_vm1, %v6527_v27  ;;  %v7959_v27 = vld [vmem:[#allocation13_spill] sm:$0xff] }
  0xc6   : > { %5621 = vmatmul.mubr.msk.f32.gmra.mrb[24].mxu1 %vm320_vm1, %v6997_v0  ;;  %5797 = vmatmul.mubr.msk.f32.gmra.mrb[8].mxu0 %vm320_vm1, %v6541_v29  ;;  %v7961_v29 = vld [vmem:[#allocation15_spill] sm:$0xff] }
  0xc7   : > { %5623 = vmatprep.mubr.msk.f32.mxu1 %vm320_vm1, %v7000_v60  ;;  %5799 = vmatprep.mubr.msk.f32.mxu0 %vm320_vm1, %v6547_v31  ;;  %v7963_v31 = vld [vmem:[#allocation17_spill] sm:$0xff] }
  0xca   : > { %5624 = vmatmul.mubr.msk.f32.gmra.mrb[26].mxu1 %vm320_vm1, %v7011_v4  ;;  %5800 = vmatmul.mubr.msk.f32.gmra.mrb[10].mxu0 %vm320_vm1, %v6561_v33  ;;  %v4912_v33 = vld [vmem:[%s6415_s8 + $0x199] sm:$0xff] }
  0xcb   : > { %5626 = vmatprep.mubr.msk.f32.mxu1 %vm320_vm1, %v7014_v2  ;;  %5802 = vmatprep.mubr.msk.f32.mxu0 %vm320_vm1, %v6567_v35  ;;  %v4913_v35 = vld [vmem:[%s6415_s8 + $0x1a1] sm:$0xff] }
  0xce   : > { %5627 = vmatmul.mubr.msk.f32.gmra.mrb[28].mxu1 %vm320_vm1, %v7025_v8  ;;  %5803 = vmatmul.mubr.msk.f32.gmra.mrb[12].mxu0 %vm320_vm1, %v6581_v37  ;;  %v7967_v37 = vld [vmem:[#allocation21_spill] sm:$0xff] }
  0xcf   : > { %5629 = vmatprep.mubr.msk.f32.mxu1 %vm320_vm1, %v7028_v6  ;;  %5805 = vmatprep.mubr.msk.f32.mxu0 %vm320_vm1, %v6793_v61 }
  0xd2   : > { %5630 = vmatmul.mubr.msk.f32.gmra.mrb[30].mxu1 %vm320_vm1, %v7039_v41  ;;  %5806 = vmatmul.mubr.msk.f32.gmra.mrb[14].mxu0 %vm320_vm1, %v6812_v1 }
  0xd3   : > { %5658 = vmatprep.mubr.msk.f32.mxu1 %vm320_vm1, %v6793_v61  ;;  %5808 = vmatprep.mubr.msk.f32.mxu0 %vm320_vm1, %v6820_v3 }
  0xd6   : > { %5659 = vmatmul.mubr.msk.f32.vlgmr.msra.gmra.mrb[16].mxu1 %vm320_vm1, %v6812_v1  ;;  %5809 = vmatmul.mubr.msk.f32.gmra.mrb[16].mxu0 %vm320_vm1, %v6836_v5 }
  0xd7   : > { %5661 = vmatprep.mubr.msk.f32.mxu1 %vm320_vm1, %v6820_v3  ;;  %5811 = vmatprep.mubr.msk.f32.mxu0 %vm320_vm1, %v6842_v7 }
  0xda   : > { %5662 = vmatmul.mubr.msk.f32.gmra.mrb[18].mxu1 %vm320_vm1, %v6836_v5  ;;  %5812 = vmatmul.mubr.msk.f32.gmra.mrb[18].mxu0 %vm320_vm1, %v6856_v9 }
  0xdb   : > { %5664 = vmatprep.mubr.msk.f32.mxu1 %vm320_vm1, %v6842_v7  ;;  %5814 = vmatprep.mubr.msk.f32.mxu0 %vm320_vm1, %v6862_v15  ;;  %v5049_v7 = vld [vmem:[%s7889_s3 + $0x4] sm:$0xf] }
  0xde   : > { %5665 = vmatmul.mubr.msk.f32.gmra.mrb[20].mxu1 %vm320_vm1, %v6856_v9  ;;  %5815 = vmatmul.mubr.msk.f32.gmra.mrb[20].mxu0 %vm320_vm1, %v6876_v55 }
  0xdf   : > { %5667 = vmatprep.mubr.msk.f32.mxu1 %vm320_vm1, %v6862_v15  ;;  %5817 = vmatprep.mubr.msk.f32.mxu0 %vm320_vm1, %v6882_v58 }
  0xe2   : > { %5668 = vmatmul.mubr.msk.f32.gmra.mrb[22].mxu1 %vm320_vm1, %v6876_v55  ;;  %5818 = vmatmul.mubr.msk.f32.gmra.mrb[22].mxu0 %vm320_vm1, %v6896_v54 }
  0xe3   : > { %5670 = vmatprep.mubr.msk.f32.mxu1 %vm320_vm1, %v6882_v58  ;;  %5820 = vmatprep.mubr.msk.f32.mxu0 %vm320_vm1, %v6902_v52  ;;  %v7973_v58 = vld [vmem:[#allocation27_spill] sm:$0xff] }
  0xe6   : > { %5671 = vmatmul.mubr.msk.f32.gmra.mrb[24].mxu1 %vm320_vm1, %v6896_v54  ;;  %5821 = vmatmul.mubr.msk.f32.gmra.mrb[24].mxu0 %vm320_vm1, %v6916_v50  ;;  %v3777_v54 = vld [vmem:[%s7889_s3] sm:$0xf] }
  0xe7   : > { %5673 = vmatprep.mubr.msk.f32.mxu1 %vm320_vm1, %v6902_v52  ;;  %5823 = vmatprep.mubr.msk.f32.mxu0 %vm320_vm1, %v6922_v48  ;;  %v7972_v52 = vld [vmem:[#allocation26_spill] sm:$0xff] }
  0xe8   : > { %5932 = vmatprep.subr.msk.mxu1 %vm417_vm0, %v3777_v54 }
  0xe9   : > { %5933 = vmatpush3.msk.msra.mxu1 %vm417_vm0, %v3777_v54 }
  0xea   : > { %5674 = vmatmul.mubr.msk.f32.gmra.mrb[26].mxu1 %vm320_vm1, %v6916_v50  ;;  %5824 = vmatmul.mubr.msk.f32.gmra.mrb[26].mxu0 %vm320_vm1, %v6936_v46  ;;  %v7970_v50 = vld [vmem:[#allocation24_spill] sm:$0xff] }
  0xeb   : > { %5676 = vmatprep.mubr.msk.f32.mxu1 %vm320_vm1, %v6922_v48  ;;  %5826 = vmatprep.mubr.msk.f32.mxu0 %vm320_vm1, %v4844_v10  ;;  %v7969_v48 = vld [vmem:[#allocation23_spill] sm:$0xff] }
  0xec   : > { %5982 = vmatprep.subr.msk.mxu1 %vm417_vm0, %v5049_v7 }
  0xee   : > { %5677 = vmatmul.mubr.msk.f32.gmra.mrb[28].mxu1 %vm320_vm1, %v6936_v46  ;;  %5827 = vmatmul.mubr.msk.f32.gmra.mrb[28].mxu0 %vm320_vm1, %v4845_v12  ;;  %v7968_v46 = vld [vmem:[#allocation22_spill] sm:$0xff] }
  0xef   : > { %5679 = vmatprep.mubr.msk.f32.mxu1 %vm320_vm1, %v4844_v10  ;;  %5829 = vmatprep.mubr.msk.f32.mxu0 %vm320_vm1, %v4846_v14 }
  0xf2   : > { %5680 = vmatmul.mubr.msk.f32.gmra.mrb[30].mxu1 %vm320_vm1, %v4845_v12  ;;  %5830 = vmatmul.mubr.msk.f32.gmra.mrb[30].mxu0 %vm320_vm1, %v4847_v17 }
  0xf3   : > { %5834 = vmatprep.mubr.msk.f32.mxu0 %vm320_vm1, %v6454_v13  ;;  %v7948_v13 = vld [vmem:[#allocation2_spill] sm:$0xff] }
  0xf6   : > { %5835 = vmatmul.mubr.msk.f32.vlgmr.msra.gmra.mrb[0].mxu0 %vm320_vm1, %v6476_v16  ;;  %v7949_v16 = vld [vmem:[#allocation3_spill] sm:$0xff] }
  0xf7   : > { %5883 = vmatpush3.msk.msra.mxu0 %vm417_vm0, %v7066_v51  ;;  %5837 = vmatprep.mubr.msk.f32.mxu0 %vm320_vm1, %v6482_v18  ;;  %v7950_v18 = vld [vmem:[#allocation4_spill] sm:$0xff]  ;;  %v7971_v51 = vld [vmem:[#allocation25_spill] sm:$0xff] }
  0xfa   : > { %5838 = vmatmul.mubr.msk.f32.gmra.mrb[2].mxu0 %vm320_vm1, %v6498_v20  ;;  %v7952_v20 = vld [vmem:[#allocation6_spill] sm:$0xff] }
  0xfb   : > { %5840 = vmatprep.mubr.msk.f32.mxu0 %vm320_vm1, %v6504_v22  ;;  %v7954_v22 = vld [vmem:[#allocation8_spill] sm:$0xff] }
  0xfe   : > { %5841 = vmatmul.mubr.msk.f32.gmra.mrb[4].mxu0 %vm320_vm1, %v6518_v24  ;;  %v7956_v24 = vld [vmem:[#allocation10_spill] sm:$0xff] }
  0xff   : > { %5843 = vmatprep.mubr.msk.f32.mxu0 %vm320_vm1, %v6524_v26  ;;  %v7958_v26 = vld [vmem:[#allocation12_spill] sm:$0xff] }
 0x102   : > { %5844 = vmatmul.mubr.msk.f32.gmra.mrb[6].mxu0 %vm320_vm1, %v6538_v28  ;;  %v7960_v28 = vld [vmem:[#allocation14_spill] sm:$0xff] }
 0x103   : > { %5846 = vmatprep.mubr.msk.f32.mxu0 %vm320_vm1, %v6544_v30  ;;  %v7962_v30 = vld [vmem:[#allocation16_spill] sm:$0xff] }
 0x106   : > { %5847 = vmatmul.mubr.msk.f32.gmra.mrb[8].mxu0 %vm320_vm1, %v6558_v32  ;;  %v7964_v32 = vld [vmem:[#allocation18_spill] sm:$0xff] }
 0x107   : > { %5849 = vmatprep.mubr.msk.f32.mxu0 %vm320_vm1, %v6564_v34  ;;  %v7965_v34 = vld [vmem:[#allocation19_spill] sm:$0xff] }
 0x10a   : > { %5850 = vmatmul.mubr.msk.f32.gmra.mrb[10].mxu0 %vm320_vm1, %v6578_v36  ;;  %v7966_v36 = vld [vmem:[#allocation20_spill] sm:$0xff] }
 0x10b   : > { %5852 = vmatprep.mubr.msk.f32.mxu0 %vm320_vm1, %v7948_v13 }
 0x10e   : > { %5853 = vmatmul.mubr.msk.f32.gmra.mrb[12].mxu0 %vm320_vm1, %v7949_v16  ;;  %v7384_v16 = vld [vmem:[%s7888_s2] ss:$0 sm:$0xff] }
 0x10f   : > { %5855 = vmatprep.mubr.msk.f32.mxu0 %vm320_vm1, %v7950_v18 }
 0x112   : > { %5856 = vmatmul.mubr.msk.f32.gmra.mrb[14].mxu0 %vm320_vm1, %v7951_v19 }
 0x113   : > { %5858 = vmatprep.mubr.msk.f32.mxu0 %vm320_vm1, %v7952_v20 }
 0x116   : > { %5859 = vmatmul.mubr.msk.f32.gmra.mrb[16].mxu0 %vm320_vm1, %v7953_v21 }
 0x117   : > { %5861 = vmatprep.mubr.msk.f32.mxu0 %vm320_vm1, %v7954_v22 }
 0x11a   : > { %5862 = vmatmul.mubr.msk.f32.gmra.mrb[18].mxu0 %vm320_vm1, %v7955_v23 }
 0x11b   : > { %5864 = vmatprep.mubr.msk.f32.mxu0 %vm320_vm1, %v7956_v24 }
 0x11e   : > { %5865 = vmatmul.mubr.msk.f32.gmra.mrb[20].mxu0 %vm320_vm1, %v7957_v25 }
 0x11f   : > { %5867 = vmatprep.mubr.msk.f32.mxu0 %vm320_vm1, %v7958_v26 }
 0x122   : > { %5868 = vmatmul.mubr.msk.f32.gmra.mrb[22].mxu0 %vm320_vm1, %v7959_v27 }
 0x123   : > { %5870 = vmatprep.mubr.msk.f32.mxu0 %vm320_vm1, %v7960_v28 }
 0x126   : > { %5871 = vmatmul.mubr.msk.f32.gmra.mrb[24].mxu0 %vm320_vm1, %v7961_v29 }
 0x127   : > { %5873 = vmatprep.mubr.msk.f32.mxu0 %vm320_vm1, %v7962_v30 }
 0x12a   : > { %5874 = vmatmul.mubr.msk.f32.gmra.mrb[26].mxu0 %vm320_vm1, %v7963_v31 }
 0x12b   : > { %5876 = vmatprep.mubr.msk.f32.mxu0 %vm320_vm1, %v7964_v32 }
 0x12e   : > { %5877 = vmatmul.mubr.msk.f32.gmra.mrb[28].mxu0 %vm320_vm1, %v7965_v34 }
 0x12f   : > { %5879 = vmatprep.mubr.msk.f32.mxu0 %vm320_vm1, %v4912_v33 }
 0x132   : > { %5880 = vmatmul.mubr.msk.f32.gmra.mrb[30].mxu0 %vm320_vm1, %v4913_v35 }
 0x133   : > { %5884 = vmatprep.mubr.msk.f32.mxu0 %vm320_vm1, %v6796_v62 }
 0x136   : > { %5885 = vmatmul.mubr.msk.f32.vlgmr.msra.gmra.mrb[0].mxu0 %vm320_vm1, %v7966_v36 }
 0x137   : > { %5887 = vmatprep.mubr.msk.f32.mxu0 %vm320_vm1, %v7967_v37 }
 0x13a   : > { %5888 = vmatmul.mubr.msk.f32.gmra.mrb[2].mxu0 %vm320_vm1, %v7968_v46 }
 0x13b   : > { %5890 = vmatprep.mubr.msk.f32.mxu0 %vm320_vm1, %v7969_v48 }
 0x13e   : > { %5891 = vmatmul.mubr.msk.f32.gmra.mrb[4].mxu0 %vm320_vm1, %v7970_v50 }
 0x13f   : > { %5893 = vmatprep.mubr.msk.f32.mxu0 %vm320_vm1, %v7971_v51 }
 0x142   : > { %5894 = vmatmul.mubr.msk.f32.gmra.mrb[6].mxu0 %vm320_vm1, %v6879_v56 }
 0x143   : > { %5896 = vmatprep.mubr.msk.f32.mxu0 %vm320_vm1, %v7972_v52 }
 0x146   : > { %5897 = vmatmul.mubr.msk.f32.gmra.mrb[8].mxu0 %vm320_vm1, %v6899_v53 }
 0x147   : > { %5899 = vmatprep.mubr.msk.f32.mxu0 %vm320_vm1, %v7973_v58 }
 0x14a   : > { %5900 = vmatmul.mubr.msk.f32.gmra.mrb[10].mxu0 %vm320_vm1, %v6919_v49 }
 0x14b   : > { %5902 = vmatprep.mubr.msk.f32.mxu0 %vm320_vm1, %v6925_v47  ;;  %v4979_v47 = vld [vmem:[%s6415_s8 + $0x1a2] sm:$0xff] }
 0x14e   : > { %5903 = vmatmul.mubr.msk.f32.gmra.mrb[12].mxu0 %vm320_vm1, %v6939_v45 }
 0x14f   : > { %5905 = vmatprep.mubr.msk.f32.mxu0 %vm320_vm1, %v6943_v43 }
 0x152   : > { %5906 = vmatmul.mubr.msk.f32.gmra.mrb[14].mxu0 %vm320_vm1, %v6954_v40  ;;  %v4978_v40 = vld [vmem:[%s6415_s8 + $0x19a] sm:$0xff] }
 0x153   : > { %5908 = vmatprep.mubr.msk.f32.mxu0 %vm320_vm1, %v6957_v39 }
 0x156   : > { %5909 = vmatmul.mubr.msk.f32.gmra.mrb[16].mxu0 %vm320_vm1, %v6967_v44 }
 0x157   : > { %5911 = vmatprep.mubr.msk.f32.mxu0 %vm320_vm1, %v6970_v38 }
 0x15a   : > { %5912 = vmatmul.mubr.msk.f32.gmra.mrb[18].mxu0 %vm320_vm1, %v6983_v42 }
 0x15b   : > { %5914 = vmatprep.mubr.msk.f32.mxu0 %vm320_vm1, %v6986_v59 }
 0x15e   : > { %5915 = vmatmul.mubr.msk.f32.gmra.mrb[20].mxu0 %vm320_vm1, %v6997_v0 }
 0x15f   : > { %5917 = vmatprep.mubr.msk.f32.mxu0 %vm320_vm1, %v7000_v60 }
 0x162   : > { %5918 = vmatmul.mubr.msk.f32.gmra.mrb[22].mxu0 %vm320_vm1, %v7011_v4 }
 0x163   : > { %5920 = vmatprep.mubr.msk.f32.mxu0 %vm320_vm1, %v7014_v2 }
 0x166   : > { %5921 = vmatmul.mubr.msk.f32.gmra.mrb[24].mxu0 %vm320_vm1, %v7025_v8 }
 0x167   : > { %5923 = vmatprep.mubr.msk.f32.mxu0 %vm320_vm1, %v7028_v6 }
 0x169   : > { %v5586_v38 = vpop.f32.mrb[0].mxu1 }
 0x16a   : > { %v1169_v39 = vpop.f32.mrb[1].mxu1  ;;  %5924 = vmatmul.mubr.msk.f32.gmra.mrb[26].mxu0 %vm320_vm1, %v7039_v41 }
 0x16b   : > { %5926 = vmatprep.mubr.msk.f32.mxu0 %vm320_vm1, %v7042_v11 }
 0x16d   : > { %v5589_v43 = vpop.f32.mrb[2].mxu1 }
 0x16e   : > { %v1179_v45 = vpop.f32.mrb[3].mxu1  ;;  %5927 = vmatmul.mubr.msk.f32.gmra.mrb[28].mxu0 %vm320_vm1, %v7053_v57 }
 0x16f   : > { %5929 = vmatprep.mubr.msk.f32.mxu0 %vm320_vm1, %v4978_v40 }
 0x171   : > { %v5592_v49 = vpop.f32.mrb[4].mxu1 }
 0x172   : > { %v1189_v53 = vpop.f32.mrb[5].mxu1  ;;  %5930 = vmatmul.mubr.msk.f32.gmra.mrb[30].mxu0 %vm320_vm1, %v4979_v47 }
 0x175   : > { %v5595_v61 = vpop.f32.mrb[6].mxu1 }
 0x176   : > { %v1199_v62 = vpop.f32.mrb[7].mxu1 }
 0x179   : > { %v7329_v63 = vpop.f32.mrb[8].mxu1 }
 0x17a   : > { %v7331_v1 = vpop.f32.mrb[9].mxu1 }
 0x17d   : > { %v7333_v2 = vpop.f32.mrb[10].mxu1 }
 0x17e   : > { %v7335_v3 = vpop.f32.mrb[11].mxu1 }
 0x181   : > { %v7337_v4 = vpop.f32.mrb[12].mxu1 }
 0x182   : > { %v7339_v57 = vpop.f32.mrb[13].mxu1 }
 0x185   : > { %v7341_v5 = vpop.f32.mrb[14].mxu1 }
 0x186   : > { %v7343_v6 = vpop.f32.mrb[15].mxu1 }
 0x1a9   : > { %v7349_v8 = vpop.f32.mrb[16].mxu1 }
 0x1aa   : > { %v7351_v9 = vpop.f32.mrb[17].mxu1 }
 0x1ad   : > { %v7353_v11 = vpop.f32.mrb[18].mxu1 }
 0x1ae   : > { %v7355_v15 = vpop.f32.mrb[19].mxu1 }
 0x1b1   : > { %v7357_v41 = vpop.f32.mrb[20].mxu1 }
 0x1b2   : > { %v7359_v55 = vpop.f32.mrb[21].mxu1 }
 0x1b5   : > { %v7361_v56 = vpop.f32.mrb[22].mxu1 }
 0x1b6   : > { %v7363_v44 = vpop.f32.mrb[23].mxu1 }
 0x1b9   : > { %v7365_v42 = vpop.f32.mrb[24].mxu1 }
 0x1ba   : > { %v7367_v59 = vpop.f32.mrb[25].mxu1 }
 0x1bd   : > { %v7369_v0 = vpop.f32.mrb[26].mxu1 }
 0x1be   : > { %v7371_v60 = vpop.f32.mrb[27].mxu1 }
 0x1c1   : > { %v7373_v10 = vpop.f32.mrb[28].mxu1 }
 0x1c2   : > { %v7375_v12 = vpop.f32.mrb[29].mxu1 }
 0x1c5   : > { %v7377_v14 = vpop.f32.mrb[30].mxu1 }
 0x1c6   : > { %v7379_v17 = vpop.f32.mrb[31].mxu1 }
 0x209   : > { %v5886_v13 = vpop.f32.mrb[0].mxu0 }
 0x20a   : > { %v6034_v18 = vadd.f32 %v5886_v13, %v5586_v38  ;;  %v3515_v19 = vpop.f32.mrb[1].mxu0 }
 0x20b   : > { %v6035_v20 = vadd.f32 %v3515_v19, %v1169_v39 }
 0x20c   : > { %v7387_v21 = vadd.f32 %v6034_v18, %v7384_v16 }
 0x20d   : > { %v7390_v22 = vadd.f32 %v6035_v20, %v7384_v16  ;;  %v5889_v23 = vpop.f32.mrb[2].mxu0 }
 0x20e   : > { %v6036_v24 = vadd.f32 %v5889_v23, %v5589_v43  ;;  %v3525_v25 = vpop.f32.mrb[3].mxu0  ;;  %v3746_v28 = vmax.f32 %v7387_v21, 0.0 }
 0x20f   : > { %v3745_v26 = vmax.f32 %v7390_v22, 0.0  ;;  %v6037_v27 = vadd.f32 %v3525_v25, %v1179_v45  ;;  %v7678_v22 = vld [vmem:[%s7890_s4] ss:$0 sm:$0xff] }
 0x210   : > { %v7395_v29 = vadd.f32 %v6036_v24, %v7384_v16 }
 0x211   : > { %v7398_v30 = vadd.f32 %v6037_v27, %v7384_v16  ;;  %v5892_v31 = vpop.f32.mrb[4].mxu0  ;;  %5934 = vmatprep.mubr.msk.f32.mxu1 %vm320_vm1, %v3745_v26 }
 0x212   : > { %v6038_v32 = vadd.f32 %v5892_v31, %v5592_v49  ;;  %v3535_v33 = vpop.f32.mrb[5].mxu0  ;;  %5935 = vmatmul.mubr.msk.f32.vlgmr.msra.gmra.mrb[32].mxu1 %vm320_vm1, %v3746_v28  ;;  %v3748_v36 = vmax.f32 %v7395_v29, 0.0 }
 0x213   : > { %v3747_v34 = vmax.f32 %v7398_v30, 0.0  ;;  %v6039_v35 = vadd.f32 %v3535_v33, %v1189_v53  ;;  %5983 = vmatpush3.msk.msra.mxu1 %vm417_vm0, %v5049_v7 }
 0x214   : > { %v7410_v37 = vadd.f32 %v6038_v32, %v7384_v16 }
 0x215   : > { %v7413_v46 = vadd.f32 %v6039_v35, %v7384_v16  ;;  %v5895_v48 = vpop.f32.mrb[6].mxu0  ;;  %5937 = vmatprep.mubr.msk.f32.mxu1 %vm320_vm1, %v3747_v34 }
 0x216   : > { %v6040_v50 = vadd.f32 %v5895_v48, %v5595_v61  ;;  %v3545_v51 = vpop.f32.mrb[7].mxu0  ;;  %5938 = vmatmul.mubr.msk.f32.gmra.mrb[34].mxu1 %vm320_vm1, %v3748_v36  ;;  %v3750_v58 = vmax.f32 %v7410_v37, 0.0 }
 0x217   : > { %v3749_v52 = vmax.f32 %v7413_v46, 0.0  ;;  %v6041_v54 = vadd.f32 %v3545_v51, %v1199_v62 }
 0x218   : > { %v7424_v38 = vadd.f32 %v6040_v50, %v7384_v16 }
 0x219   : > { %v7427_v39 = vadd.f32 %v6041_v54, %v7384_v16  ;;  %v5898_v40 = vpop.f32.mrb[8].mxu0  ;;  %5940 = vmatprep.mubr.msk.f32.mxu1 %vm320_vm1, %v3749_v52 }
 0x21a   : > { %v6042_v43 = vadd.f32 %v5898_v40, %v7329_v63  ;;  %v3555_v45 = vpop.f32.mrb[9].mxu0  ;;  %5941 = vmatmul.mubr.msk.f32.gmra.mrb[36].mxu1 %vm320_vm1, %v3750_v58  ;;  %v3752_v53 = vmax.f32 %v7424_v38, 0.0 }
 0x21b   : > { %v3751_v47 = vmax.f32 %v7427_v39, 0.0  ;;  %v6043_v49 = vadd.f32 %v3555_v45, %v7331_v1 }
 0x21c   : > { %v7440_v61 = vadd.f32 %v6042_v43, %v7384_v16 }
 0x21d   : > { %v7443_v62 = vadd.f32 %v6043_v49, %v7384_v16  ;;  %v5901_v7 = vpop.f32.mrb[10].mxu0  ;;  %5943 = vmatprep.mubr.msk.f32.mxu1 %vm320_vm1, %v3751_v47 }
 0x21e   : > { %v6044_v63 = vadd.f32 %v5901_v7, %v7333_v2  ;;  %v3565_v13 = vpop.f32.mrb[11].mxu0  ;;  %5944 = vmatmul.mubr.msk.f32.gmra.mrb[38].mxu1 %vm320_vm1, %v3752_v53  ;;  %v3754_v19 = vmax.f32 %v7440_v61, 0.0 }
 0x21f   : > { %v3753_v1 = vmax.f32 %v7443_v62, 0.0  ;;  %v6045_v18 = vadd.f32 %v3565_v13, %v7335_v3 }
 0x220   : > { %v7456_v20 = vadd.f32 %v6044_v63, %v7384_v16 }
 0x221   : > { %v7459_v23 = vadd.f32 %v6045_v18, %v7384_v16  ;;  %v5904_v24 = vpop.f32.mrb[12].mxu0  ;;  %5946 = vmatprep.mubr.msk.f32.mxu1 %vm320_vm1, %v3753_v1 }
 0x222   : > { %v6046_v2 = vadd.f32 %v5904_v24, %v7337_v4  ;;  %v3575_v25 = vpop.f32.mrb[13].mxu0  ;;  %5947 = vmatmul.mubr.msk.f32.gmra.mrb[40].mxu1 %vm320_vm1, %v3754_v19  ;;  %v3756_v31 = vmax.f32 %v7456_v20, 0.0 }
 0x223   : > { %v3755_v3 = vmax.f32 %v7459_v23, 0.0  ;;  %v6047_v27 = vadd.f32 %v3575_v25, %v7339_v57 }
 0x224   : > { %v7472_v32 = vadd.f32 %v6046_v2, %v7384_v16 }
 0x225   : > { %v7475_v33 = vadd.f32 %v6047_v27, %v7384_v16  ;;  %v5907_v35 = vpop.f32.mrb[14].mxu0  ;;  %5949 = vmatprep.mubr.msk.f32.mxu1 %vm320_vm1, %v3755_v3 }
 0x226   : > { %v6048_v4 = vadd.f32 %v5907_v35, %v7341_v5  ;;  %v3585_v48 = vpop.f32.mrb[15].mxu0  ;;  %5950 = vmatmul.mubr.msk.f32.gmra.mrb[42].mxu1 %vm320_vm1, %v3756_v31  ;;  %v3758_v51 = vmax.f32 %v7472_v32, 0.0 }
 0x227   : > { %v3757_v57 = vmax.f32 %v7475_v33, 0.0  ;;  %v6049_v50 = vadd.f32 %v3585_v48, %v7343_v6 }
 0x228   : > { %v7488_v54 = vadd.f32 %v6048_v4, %v7384_v16 }
 0x229   : > { %v7491_v40 = vadd.f32 %v6049_v50, %v7384_v16  ;;  %v5910_v43 = vpop.f32.mrb[16].mxu0  ;;  %5952 = vmatprep.mubr.msk.f32.mxu1 %vm320_vm1, %v3757_v57 }
 0x22a   : > { %v6050_v5 = vadd.f32 %v5910_v43, %v7349_v8  ;;  %v3595_v45 = vpop.f32.mrb[17].mxu0  ;;  %5953 = vmatmul.mubr.msk.f32.gmra.mrb[44].mxu1 %vm320_vm1, %v3758_v51  ;;  %v3760_v7 = vmax.f32 %v7488_v54, 0.0 }
 0x22b   : > { %v3759_v6 = vmax.f32 %v7491_v40, 0.0  ;;  %v6051_v49 = vadd.f32 %v3595_v45, %v7351_v9 }
 0x22c   : > { %v7504_v63 = vadd.f32 %v6050_v5, %v7384_v16 }
 0x22d   : > { %v7507_v13 = vadd.f32 %v6051_v49, %v7384_v16  ;;  %v5913_v18 = vpop.f32.mrb[18].mxu0  ;;  %5955 = vmatprep.mubr.msk.f32.mxu1 %vm320_vm1, %v3759_v6 }
 0x22e   : > { %v6052_v8 = vadd.f32 %v5913_v18, %v7353_v11  ;;  %v3605_v24 = vpop.f32.mrb[19].mxu0  ;;  %5956 = vmatmul.mubr.msk.f32.gmra.mrb[46].mxu1 %vm320_vm1, %v3760_v7  ;;  %v3762_v25 = vmax.f32 %v7504_v63, 0.0 }
 0x22f   : > { %v3761_v9 = vmax.f32 %v7507_v13, 0.0  ;;  %v6053_v2 = vadd.f32 %v3605_v24, %v7355_v15 }
 0x230   : > { %v7520_v27 = vadd.f32 %v6052_v8, %v7384_v16 }
 0x231   : > { %v7523_v35 = vadd.f32 %v6053_v2, %v7384_v16  ;;  %v5916_v4 = vpop.f32.mrb[20].mxu0  ;;  %5958 = vmatprep.mubr.msk.f32.mxu1 %vm320_vm1, %v3761_v9 }
 0x232   : > { %v6054_v11 = vadd.f32 %v5916_v4, %v7357_v41  ;;  %v3615_v48 = vpop.f32.mrb[21].mxu0  ;;  %5959 = vmatmul.mubr.msk.f32.gmra.mrb[48].mxu1 %vm320_vm1, %v3762_v25  ;;  %v7921_v43 = vmax.f32 %v7520_v27, 0.0 }
 0x233   : > { %v3763_v15 = vmax.f32 %v7523_v35, 0.0  ;;  %v6055_v50 = vadd.f32 %v3615_v48, %v7359_v55 }
 0x234   : > { %v7536_v5 = vadd.f32 %v6054_v11, %v7384_v16 }
 0x235   : > { %v7539_v45 = vadd.f32 %v6055_v50, %v7384_v16  ;;  %v5919_v49 = vpop.f32.mrb[22].mxu0  ;;  %5961 = vmatprep.mubr.msk.f32.mxu1 %vm320_vm1, %v3763_v15 }
 0x236   : > { %v6056_v41 = vadd.f32 %v5919_v49, %v7361_v56  ;;  %v3625_v18 = vpop.f32.mrb[23].mxu0  ;;  %5962 = vmatmul.mubr.msk.f32.gmra.mrb[50].mxu1 %vm320_vm1, %v7921_v43  ;;  %v7918_v24 = vmax.f32 %v7536_v5, 0.0 }
 0x237   : > { %v7919_v55 = vmax.f32 %v7539_v45, 0.0  ;;  %v6057_v8 = vadd.f32 %v3625_v18, %v7363_v44 }
 0x238   : > { %v7552_v2 = vadd.f32 %v6056_v41, %v7384_v16 }
 0x239   : > { %v7555_v4 = vadd.f32 %v6057_v8, %v7384_v16  ;;  %v5922_v11 = vpop.f32.mrb[24].mxu0  ;;  %5964 = vmatprep.mubr.msk.f32.mxu1 %vm320_vm1, %v7919_v55 }
 0x23a   : > { %v6058_v56 = vadd.f32 %v5922_v11, %v7365_v42  ;;  %v3635_v48 = vpop.f32.mrb[25].mxu0  ;;  %5965 = vmatmul.mubr.msk.f32.gmra.mrb[52].mxu1 %vm320_vm1, %v7918_v24  ;;  %v3768_v49 = vmax.f32 %v7552_v2, 0.0 }
 0x23b   : > { %v7920_v44 = vmax.f32 %v7555_v4, 0.0  ;;  %v6059_v50 = vadd.f32 %v3635_v48, %v7367_v59  ;;  %v7977_v21 = vmax.f32 %v7555_v4, 0.0 }
 0x23c   : > { %v7568_v41 = vadd.f32 %v6058_v56, %v7384_v16 }
 0x23d   : > { %v3737_v18 = vadd.f32 %v6059_v50, %v7384_v16  ;;  %v5925_v8 = vpop.f32.mrb[26].mxu0  ;;  %5967 = vmatprep.mubr.msk.f32.mxu1 %vm320_vm1, %v7920_v44 }
 0x23e   : > { %v6060_v42 = vadd.f32 %v5925_v8, %v7369_v0  ;;  %v3645_v11 = vpop.f32.mrb[27].mxu0  ;;  %5968 = vmatmul.mubr.msk.f32.gmra.mrb[54].mxu1 %vm320_vm1, %v3768_v49  ;;  %v3770_v2 = vmax.f32 %v7568_v41, 0.0 }
 0x23f   : > { %v3769_v24 = vmax.f32 %v3737_v18, 0.0  ;;  %v6061_v59 = vadd.f32 %v3645_v11, %v7371_v60 }
 0x240   : > { %v3740_v56 = vadd.f32 %v6060_v42, %v7384_v16 }
 0x241   : > { %v3739_v48 = vadd.f32 %v6061_v59, %v7384_v16  ;;  %v5928_v50 = vpop.f32.mrb[28].mxu0  ;;  %5970 = vmatprep.mubr.msk.f32.mxu1 %vm320_vm1, %v3769_v24 }
 0x242   : > { %v6062_v55 = vadd.f32 %v5928_v50, %v7373_v10  ;;  %v3655_v44 = vpop.f32.mrb[29].mxu0  ;;  %5971 = vmatmul.mubr.msk.f32.gmra.mrb[56].mxu1 %vm320_vm1, %v3770_v2  ;;  %v3772_v18 = vmax.f32 %v3740_v56, 0.0 }
 0x243   : > { %v3771_v0 = vmax.f32 %v3739_v48, 0.0  ;;  %v6063_v8 = vadd.f32 %v3655_v44, %v7375_v12 }
 0x244   : > { %v3742_v60 = vadd.f32 %v6062_v55, %v7384_v16 }
 0x245   : > { %v3741_v41 = vadd.f32 %v6063_v8, %v7384_v16  ;;  %v5931_v11 = vpop.f32.mrb[30].mxu0  ;;  %5973 = vmatprep.mubr.msk.f32.mxu1 %vm320_vm1, %v3771_v0 }
 0x246   : > { %v6064_v42 = vadd.f32 %v5931_v11, %v7377_v14  ;;  %v3665_v59 = vpop.f32.mrb[31].mxu0  ;;  %5974 = vmatmul.mubr.msk.f32.gmra.mrb[58].mxu1 %vm320_vm1, %v3772_v18  ;;  %v3774_v43 = vmax.f32 %v3742_v60, 0.0  ;;  %v7974_v14 = vmax.f32 %v7520_v27, 0.0 }
 0x247   : > { %v3773_v10 = vmax.f32 %v3741_v41, 0.0  ;;  %v6065_v50 = vadd.f32 %v3665_v59, %v7379_v17  ;;  %v7975_v17 = vmax.f32 %v7539_v45, 0.0 }
 0x248   : > { %v3744_v48 = vadd.f32 %v6064_v42, %v7384_v16 }
 0x249   : > { %v3743_v12 = vadd.f32 %v6065_v50, %v7384_v16  ;;  %5976 = vmatprep.mubr.msk.f32.mxu1 %vm320_vm1, %v3773_v10  ;;  %v7976_v16 = vmax.f32 %v7536_v5, 0.0 }
 0x24a   : > { %5977 = vmatmul.mubr.msk.f32.gmra.mrb[60].mxu1 %vm320_vm1, %v3774_v43  ;;  %v3776_v44 = vmax.f32 %v3744_v48, 0.0 }
 0x24b   : > { %v3775_v55 = vmax.f32 %v3743_v12, 0.0 }
 0x24d   : > { %5979 = vmatprep.mubr.msk.f32.mxu1 %vm320_vm1, %v3775_v55 }
 0x24e   : > { %5980 = vmatmul.mubr.msk.f32.gmra.mrb[62].mxu1 %vm320_vm1, %v3776_v44 }
 0x24f   : > { %5984 = vmatprep.mubr.msk.f32.mxu1 %vm320_vm1, %v3745_v26 }
 0x252   : > { %5985 = vmatmul.mubr.msk.f32.vlgmr.msra.gmra.mrb[64].mxu1 %vm320_vm1, %v3746_v28 }
 0x253   : > { %5987 = vmatprep.mubr.msk.f32.mxu1 %vm320_vm1, %v3747_v34 }
 0x256   : > { %5988 = vmatmul.mubr.msk.f32.gmra.mrb[66].mxu1 %vm320_vm1, %v3748_v36 }
 0x257   : > { %5990 = vmatprep.mubr.msk.f32.mxu1 %vm320_vm1, %v3749_v52 }
 0x25a   : > { %5991 = vmatmul.mubr.msk.f32.gmra.mrb[68].mxu1 %vm320_vm1, %v3750_v58 }
 0x25b   : > { %5993 = vmatprep.mubr.msk.f32.mxu1 %vm320_vm1, %v3751_v47 }
 0x25e   : > { %5994 = vmatmul.mubr.msk.f32.gmra.mrb[70].mxu1 %vm320_vm1, %v3752_v53 }
 0x25f   : > { %5996 = vmatprep.mubr.msk.f32.mxu1 %vm320_vm1, %v3753_v1 }
 0x262   : > { %5997 = vmatmul.mubr.msk.f32.gmra.mrb[72].mxu1 %vm320_vm1, %v3754_v19 }
 0x263   : > { %5999 = vmatprep.mubr.msk.f32.mxu1 %vm320_vm1, %v3755_v3 }
 0x266   : > { %6000 = vmatmul.mubr.msk.f32.gmra.mrb[74].mxu1 %vm320_vm1, %v3756_v31 }
 0x267   : > { %6002 = vmatprep.mubr.msk.f32.mxu1 %vm320_vm1, %v3757_v57 }
 0x26a   : > { %6003 = vmatmul.mubr.msk.f32.gmra.mrb[76].mxu1 %vm320_vm1, %v3758_v51 }
 0x26b   : > { %6005 = vmatprep.mubr.msk.f32.mxu1 %vm320_vm1, %v3759_v6 }
 0x26e   : > { %6006 = vmatmul.mubr.msk.f32.gmra.mrb[78].mxu1 %vm320_vm1, %v3760_v7 }
 0x26f   : > { %6008 = vmatprep.mubr.msk.f32.mxu1 %vm320_vm1, %v3761_v9 }
 0x272   : > { %6009 = vmatmul.mubr.msk.f32.gmra.mrb[80].mxu1 %vm320_vm1, %v3762_v25 }
 0x273   : > { %6011 = vmatprep.mubr.msk.f32.mxu1 %vm320_vm1, %v3763_v15 }
 0x276   : > { %6012 = vmatmul.mubr.msk.f32.gmra.mrb[82].mxu1 %vm320_vm1, %v7974_v14 }
 0x277   : > { %6014 = vmatprep.mubr.msk.f32.mxu1 %vm320_vm1, %v7975_v17 }
 0x27a   : > { %6015 = vmatmul.mubr.msk.f32.gmra.mrb[84].mxu1 %vm320_vm1, %v7976_v16 }
 0x27b   : > { %6017 = vmatprep.mubr.msk.f32.mxu1 %vm320_vm1, %v7977_v21 }
 0x27e   : > { %6018 = vmatmul.mubr.msk.f32.gmra.mrb[86].mxu1 %vm320_vm1, %v3768_v49 }
 0x27f   : > { %6020 = vmatprep.mubr.msk.f32.mxu1 %vm320_vm1, %v3769_v24 }
 0x282   : > { %6021 = vmatmul.mubr.msk.f32.gmra.mrb[88].mxu1 %vm320_vm1, %v3770_v2 }
 0x283   : > { %6023 = vmatprep.mubr.msk.f32.mxu1 %vm320_vm1, %v3771_v0 }
 0x286   : > { %6024 = vmatmul.mubr.msk.f32.gmra.mrb[90].mxu1 %vm320_vm1, %v3772_v18 }
 0x287   : > { %6026 = vmatprep.mubr.msk.f32.mxu1 %vm320_vm1, %v3773_v10 }
 0x28a   : > { %6027 = vmatmul.mubr.msk.f32.gmra.mrb[92].mxu1 %vm320_vm1, %v3774_v43 }
 0x28b   : > { %6029 = vmatprep.mubr.msk.f32.mxu1 %vm320_vm1, %v3775_v55 }
 0x28e   : > { %6030 = vmatmul.mubr.msk.f32.gmra.mrb[94].mxu1 %vm320_vm1, %v3776_v44 }
 0x2e5   : > { %v5936_v26 = vpop.f32.mrb[32].mxu1 }
 0x2e6   : > { %v3956_v28 = vadd.f32 %v5936_v26, %v7678_v22  ;;  %v3950_v29 = vpop.f32.mrb[33].mxu1 }
 0x2e7   : > { %v3951_v30 = vadd.f32 %v7678_v22, %v3950_v29 }
 0x2e8   : > { %4111 = vst.msk [vmem:[%s7683_s9 + $0x8] sm:$0xff] %vm4109_vm2, %v3956_v28 }
 0x2e9   : > { %4110 = vst.msk [vmem:[%s7683_s9] sm:$0xff] %vm4109_vm2, %v3951_v30  ;;  %v5939_v34 = vpop.f32.mrb[34].mxu1 }
 0x2ea   : > { %v3966_v36 = vadd.f32 %v5939_v34, %v7678_v22  ;;  %v3960_v37 = vpop.f32.mrb[35].mxu1 }
 0x2eb   : > { %v3961_v46 = vadd.f32 %v7678_v22, %v3960_v37 }
 0x2ec   : > { %4113 = vst.msk [vmem:[%s7683_s9 + $0x28] sm:$0xff] %vm4109_vm2, %v3966_v36 }
 0x2ed   : > { %4112 = vst.msk [vmem:[%s7683_s9 + $0x20] sm:$0xff] %vm4109_vm2, %v3961_v46  ;;  %v5942_v52 = vpop.f32.mrb[36].mxu1 }
 0x2ee   : > { %v3976_v58 = vadd.f32 %v5942_v52, %v7678_v22  ;;  %v3970_v38 = vpop.f32.mrb[37].mxu1 }
 0x2ef   : > { %v3971_v39 = vadd.f32 %v7678_v22, %v3970_v38 }
 0x2f0   : > { %4115 = vst.msk [vmem:[%s7683_s9 + $0x48] sm:$0xff] %vm4109_vm2, %v3976_v58 }
 0x2f1   : > { %4114 = vst.msk [vmem:[%s7683_s9 + $0x40] sm:$0xff] %vm4109_vm2, %v3971_v39  ;;  %v5945_v47 = vpop.f32.mrb[38].mxu1 }
 0x2f2   : > { %v3986_v53 = vadd.f32 %v5945_v47, %v7678_v22  ;;  %v3980_v61 = vpop.f32.mrb[39].mxu1 }
 0x2f3   : > { %v3981_v62 = vadd.f32 %v7678_v22, %v3980_v61 }
 0x2f4   : > { %4117 = vst.msk [vmem:[%s7683_s9 + $0x68] sm:$0xff] %vm4109_vm2, %v3986_v53 }
 0x2f5   : > { %4116 = vst.msk [vmem:[%s7683_s9 + $0x60] sm:$0xff] %vm4109_vm2, %v3981_v62  ;;  %v5948_v1 = vpop.f32.mrb[40].mxu1 }
 0x2f6   : > { %v3996_v19 = vadd.f32 %v5948_v1, %v7678_v22  ;;  %v3990_v20 = vpop.f32.mrb[41].mxu1 }
 0x2f7   : > { %v3991_v23 = vadd.f32 %v7678_v22, %v3990_v20 }
 0x2f8   : > { %4119 = vst.msk [vmem:[%s7683_s9 + $0x88] sm:$0xff] %vm4109_vm2, %v3996_v19 }
 0x2f9   : > { %4118 = vst.msk [vmem:[%s7683_s9 + $0x80] sm:$0xff] %vm4109_vm2, %v3991_v23  ;;  %v5951_v3 = vpop.f32.mrb[42].mxu1 }
 0x2fa   : > { %v4006_v31 = vadd.f32 %v5951_v3, %v7678_v22  ;;  %v4000_v32 = vpop.f32.mrb[43].mxu1 }
 0x2fb   : > { %v4001_v33 = vadd.f32 %v7678_v22, %v4000_v32 }
 0x2fc   : > { %4121 = vst.msk [vmem:[%s7683_s9 + $0xa8] sm:$0xff] %vm4109_vm2, %v4006_v31 }
 0x2fd   : > { %4120 = vst.msk [vmem:[%s7683_s9 + $0xa0] sm:$0xff] %vm4109_vm2, %v4001_v33  ;;  %v5954_v57 = vpop.f32.mrb[44].mxu1 }
 0x2fe   : > { %v4016_v51 = vadd.f32 %v5954_v57, %v7678_v22  ;;  %v4010_v54 = vpop.f32.mrb[45].mxu1 }
 0x2ff   : > { %v4011_v40 = vadd.f32 %v7678_v22, %v4010_v54 }
 0x300   : > { %4123 = vst.msk [vmem:[%s7683_s9 + $0xc8] sm:$0xff] %vm4109_vm2, %v4016_v51 }
 0x301   : > { %4122 = vst.msk [vmem:[%s7683_s9 + $0xc0] sm:$0xff] %vm4109_vm2, %v4011_v40  ;;  %v5957_v6 = vpop.f32.mrb[46].mxu1 }
 0x302   : > { %v4026_v7 = vadd.f32 %v5957_v6, %v7678_v22  ;;  %v4020_v63 = vpop.f32.mrb[47].mxu1 }
 0x303   : > { %v4021_v13 = vadd.f32 %v7678_v22, %v4020_v63 }
 0x304   : > { %4125 = vst.msk [vmem:[%s7683_s9 + $0xe8] sm:$0xff] %vm4109_vm2, %v4026_v7 }
 0x305   : > { %4124 = vst.msk [vmem:[%s7683_s9 + $0xe0] sm:$0xff] %vm4109_vm2, %v4021_v13  ;;  %v5960_v9 = vpop.f32.mrb[48].mxu1 }
 0x306   : > { %v4036_v25 = vadd.f32 %v5960_v9, %v7678_v22  ;;  %v4030_v27 = vpop.f32.mrb[49].mxu1 }
 0x307   : > { %v4031_v35 = vadd.f32 %v7678_v22, %v4030_v27 }
 0x308   : > { %4127 = vst.msk [vmem:[%s7683_s9 + $0x108] sm:$0xff] %vm4109_vm2, %v4036_v25 }
 0x309   : > { %4126 = vst.msk [vmem:[%s7683_s9 + $0x100] sm:$0xff] %vm4109_vm2, %v4031_v35  ;;  %v5963_v15 = vpop.f32.mrb[50].mxu1 }
 0x30a   : > { %v4046_v43 = vadd.f32 %v5963_v15, %v7678_v22  ;;  %v4040_v5 = vpop.f32.mrb[51].mxu1 }
 0x30b   : > { %v4041_v45 = vadd.f32 %v7678_v22, %v4040_v5 }
 0x30c   : > { %4129 = vst.msk [vmem:[%s7683_s9 + $0x128] sm:$0xff] %vm4109_vm2, %v4046_v43 }
 0x30d   : > { %4128 = vst.msk [vmem:[%s7683_s9 + $0x120] sm:$0xff] %vm4109_vm2, %v4041_v45  ;;  %v5966_v24 = vpop.f32.mrb[52].mxu1 }
 0x30e   : > { %v4056_v4 = vadd.f32 %v5966_v24, %v7678_v22  ;;  %v4050_v49 = vpop.f32.mrb[53].mxu1 }
 0x30f   : > { %v4051_v2 = vadd.f32 %v7678_v22, %v4050_v49 }
 0x310   : > { %4131 = vst.msk [vmem:[%s7683_s9 + $0x148] sm:$0xff] %vm4109_vm2, %v4056_v4 }
 0x311   : > { %4130 = vst.msk [vmem:[%s7683_s9 + $0x140] sm:$0xff] %vm4109_vm2, %v4051_v2  ;;  %v5969_v56 = vpop.f32.mrb[54].mxu1 }
 0x312   : > { %v4066_v0 = vadd.f32 %v5969_v56, %v7678_v22  ;;  %v4060_v8 = vpop.f32.mrb[55].mxu1 }
 0x313   : > { %v4061_v18 = vadd.f32 %v7678_v22, %v4060_v8 }
 0x314   : > { %4133 = vst.msk [vmem:[%s7683_s9 + $0x168] sm:$0xff] %vm4109_vm2, %v4066_v0 }
 0x315   : > { %4132 = vst.msk [vmem:[%s7683_s9 + $0x160] sm:$0xff] %vm4109_vm2, %v4061_v18  ;;  %v5972_v60 = vpop.f32.mrb[56].mxu1 }
 0x316   : > { %v4076_v41 = vadd.f32 %v5972_v60, %v7678_v22  ;;  %v4070_v11 = vpop.f32.mrb[57].mxu1 }
 0x317   : > { %v4071_v42 = vadd.f32 %v7678_v22, %v4070_v11 }
 0x318   : > { %4135 = vst.msk [vmem:[%s7683_s9 + $0x188] sm:$0xff] %vm4109_vm2, %v4076_v41 }
 0x319   : > { %4134 = vst.msk [vmem:[%s7683_s9 + $0x180] sm:$0xff] %vm4109_vm2, %v4071_v42  ;;  %v5975_v59 = vpop.f32.mrb[58].mxu1 }
 0x31a   : > { %v4086_v10 = vadd.f32 %v5975_v59, %v7678_v22  ;;  %v4080_v50 = vpop.f32.mrb[59].mxu1 }
 0x31b   : > { %v4081_v48 = vadd.f32 %v7678_v22, %v4080_v50 }
 0x31c   : > { %4137 = vst.msk [vmem:[%s7683_s9 + $0x1a8] sm:$0xff] %vm4109_vm2, %v4086_v10 }
 0x31d   : > { %4136 = vst.msk [vmem:[%s7683_s9 + $0x1a0] sm:$0xff] %vm4109_vm2, %v4081_v48  ;;  %v5978_v12 = vpop.f32.mrb[60].mxu1 }
 0x31e   : > { %v4096_v55 = vadd.f32 %v5978_v12, %v7678_v22  ;;  %v4090_v44 = vpop.f32.mrb[61].mxu1 }
 0x31f   : > { %v4091_v14 = vadd.f32 %v7678_v22, %v4090_v44 }
 0x320   : > { %4139 = vst.msk [vmem:[%s7683_s9 + $0x1c8] sm:$0xff] %vm4109_vm2, %v4096_v55 }
 0x321   : > { %4138 = vst.msk [vmem:[%s7683_s9 + $0x1c0] sm:$0xff] %vm4109_vm2, %v4091_v14  ;;  %v5981_v17 = vpop.f32.mrb[62].mxu1 }
 0x322   : > { %v4106_v16 = vadd.f32 %v5981_v17, %v7678_v22  ;;  %v4100_v21 = vpop.f32.mrb[63].mxu1 }
 0x323   : > { %v4101_v26 = vadd.f32 %v7678_v22, %v4100_v21 }
 0x324   : > { %4141 = vst.msk [vmem:[%s7683_s9 + $0x1e8] sm:$0xff] %vm4109_vm2, %v4106_v16 }
 0x325   : > { %4140 = vst.msk [vmem:[%s7683_s9 + $0x1e0] sm:$0xff] %vm4109_vm2, %v4101_v26  ;;  %v5986_v28 = vpop.f32.mrb[64].mxu1 }
 0x326   : > { %v4226_v29 = vadd.f32 %v5986_v28, %v7678_v22  ;;  %v4220_v30 = vpop.f32.mrb[65].mxu1 }
 0x327   : > { %v4221_v34 = vadd.f32 %v7678_v22, %v4220_v30 }
 0x328   : > { %5085 = vst.msk [vmem:[%s7683_s9 + $0x18] sm:$0xff] %vm4109_vm2, %v4226_v29 }
 0x329   : > { %5084 = vst.msk [vmem:[%s7683_s9 + $0x10] sm:$0xff] %vm4109_vm2, %v4221_v34  ;;  %v5989_v36 = vpop.f32.mrb[66].mxu1 }
 0x32a   : > { %v4236_v37 = vadd.f32 %v5989_v36, %v7678_v22  ;;  %v4230_v46 = vpop.f32.mrb[67].mxu1 }
 0x32b   : > { %v4231_v52 = vadd.f32 %v7678_v22, %v4230_v46 }
 0x32c   : > { %5087 = vst.msk [vmem:[%s7683_s9 + $0x38] sm:$0xff] %vm4109_vm2, %v4236_v37 }
 0x32d   : > { %5086 = vst.msk [vmem:[%s7683_s9 + $0x30] sm:$0xff] %vm4109_vm2, %v4231_v52  ;;  %v5992_v58 = vpop.f32.mrb[68].mxu1 }
 0x32e   : > { %v4246_v38 = vadd.f32 %v5992_v58, %v7678_v22  ;;  %v4240_v39 = vpop.f32.mrb[69].mxu1 }
 0x32f   : > { %v4241_v47 = vadd.f32 %v7678_v22, %v4240_v39 }
 0x330   : > { %5089 = vst.msk [vmem:[%s7683_s9 + $0x58] sm:$0xff] %vm4109_vm2, %v4246_v38 }
 0x331   : > { %5088 = vst.msk [vmem:[%s7683_s9 + $0x50] sm:$0xff] %vm4109_vm2, %v4241_v47  ;;  %v5995_v53 = vpop.f32.mrb[70].mxu1 }
 0x332   : > { %v4256_v61 = vadd.f32 %v5995_v53, %v7678_v22  ;;  %v4250_v62 = vpop.f32.mrb[71].mxu1 }
 0x333   : > { %v4251_v1 = vadd.f32 %v7678_v22, %v4250_v62 }
 0x334   : > { %5091 = vst.msk [vmem:[%s7683_s9 + $0x78] sm:$0xff] %vm4109_vm2, %v4256_v61 }
 0x335   : > { %5090 = vst.msk [vmem:[%s7683_s9 + $0x70] sm:$0xff] %vm4109_vm2, %v4251_v1  ;;  %v5998_v19 = vpop.f32.mrb[72].mxu1 }
 0x336   : > { %v4266_v20 = vadd.f32 %v5998_v19, %v7678_v22  ;;  %v4260_v23 = vpop.f32.mrb[73].mxu1 }
 0x337   : > { %v4261_v3 = vadd.f32 %v7678_v22, %v4260_v23 }
 0x338   : > { %5093 = vst.msk [vmem:[%s7683_s9 + $0x98] sm:$0xff] %vm4109_vm2, %v4266_v20 }
 0x339   : > { %5092 = vst.msk [vmem:[%s7683_s9 + $0x90] sm:$0xff] %vm4109_vm2, %v4261_v3  ;;  %v6001_v31 = vpop.f32.mrb[74].mxu1 }
 0x33a   : > { %v4276_v32 = vadd.f32 %v6001_v31, %v7678_v22  ;;  %v4270_v33 = vpop.f32.mrb[75].mxu1 }
 0x33b   : > { %v4271_v57 = vadd.f32 %v7678_v22, %v4270_v33 }
 0x33c   : > { %5095 = vst.msk [vmem:[%s7683_s9 + $0xb8] sm:$0xff] %vm4109_vm2, %v4276_v32 }
 0x33d   : > { %5094 = vst.msk [vmem:[%s7683_s9 + $0xb0] sm:$0xff] %vm4109_vm2, %v4271_v57  ;;  %v6004_v51 = vpop.f32.mrb[76].mxu1 }
 0x33e   : > { %v4286_v54 = vadd.f32 %v6004_v51, %v7678_v22  ;;  %v4280_v40 = vpop.f32.mrb[77].mxu1 }
 0x33f   : > { %v4281_v6 = vadd.f32 %v7678_v22, %v4280_v40 }
 0x340   : > { %5097 = vst.msk [vmem:[%s7683_s9 + $0xd8] sm:$0xff] %vm4109_vm2, %v4286_v54 }
 0x341   : > { %5096 = vst.msk [vmem:[%s7683_s9 + $0xd0] sm:$0xff] %vm4109_vm2, %v4281_v6  ;;  %v6007_v7 = vpop.f32.mrb[78].mxu1 }
 0x342   : > { %v4296_v63 = vadd.f32 %v6007_v7, %v7678_v22  ;;  %v4290_v13 = vpop.f32.mrb[79].mxu1 }
 0x343   : > { %v4291_v9 = vadd.f32 %v7678_v22, %v4290_v13 }
 0x344   : > { %5099 = vst.msk [vmem:[%s7683_s9 + $0xf8] sm:$0xff] %vm4109_vm2, %v4296_v63 }
 0x345   : > { %5098 = vst.msk [vmem:[%s7683_s9 + $0xf0] sm:$0xff] %vm4109_vm2, %v4291_v9  ;;  %v6010_v25 = vpop.f32.mrb[80].mxu1 }
 0x346   : > { %v4306_v27 = vadd.f32 %v6010_v25, %v7678_v22  ;;  %v4300_v35 = vpop.f32.mrb[81].mxu1 }
 0x347   : > { %v4301_v15 = vadd.f32 %v7678_v22, %v4300_v35 }
 0x348   : > { %5101 = vst.msk [vmem:[%s7683_s9 + $0x118] sm:$0xff] %vm4109_vm2, %v4306_v27 }
 0x349   : > { %5100 = vst.msk [vmem:[%s7683_s9 + $0x110] sm:$0xff] %vm4109_vm2, %v4301_v15  ;;  %v6013_v43 = vpop.f32.mrb[82].mxu1 }
 0x34a   : > { %v4316_v5 = vadd.f32 %v6013_v43, %v7678_v22  ;;  %v4310_v45 = vpop.f32.mrb[83].mxu1 }
 0x34b   : > { %v4311_v24 = vadd.f32 %v7678_v22, %v4310_v45 }
 0x34c   : > { %5103 = vst.msk [vmem:[%s7683_s9 + $0x138] sm:$0xff] %vm4109_vm2, %v4316_v5 }
 0x34d   : > { %5102 = vst.msk [vmem:[%s7683_s9 + $0x130] sm:$0xff] %vm4109_vm2, %v4311_v24  ;;  %v6016_v4 = vpop.f32.mrb[84].mxu1 }
 0x34e   : > { %v4326_v49 = vadd.f32 %v6016_v4, %v7678_v22  ;;  %v4320_v2 = vpop.f32.mrb[85].mxu1 }
 0x34f   : > { %v4321_v56 = vadd.f32 %v7678_v22, %v4320_v2 }
 0x350   : > { %5105 = vst.msk [vmem:[%s7683_s9 + $0x158] sm:$0xff] %vm4109_vm2, %v4326_v49 }
 0x351   : > { %5104 = vst.msk [vmem:[%s7683_s9 + $0x150] sm:$0xff] %vm4109_vm2, %v4321_v56  ;;  %v6019_v0 = vpop.f32.mrb[86].mxu1 }
 0x352   : > { %v4336_v8 = vadd.f32 %v6019_v0, %v7678_v22  ;;  %v4330_v18 = vpop.f32.mrb[87].mxu1 }
 0x353   : > { %v4331_v60 = vadd.f32 %v7678_v22, %v4330_v18 }
 0x354   : > { %5107 = vst.msk [vmem:[%s7683_s9 + $0x178] sm:$0xff] %vm4109_vm2, %v4336_v8 }
 0x355   : > { %5106 = vst.msk [vmem:[%s7683_s9 + $0x170] sm:$0xff] %vm4109_vm2, %v4331_v60  ;;  %v6022_v41 = vpop.f32.mrb[88].mxu1 }
 0x356   : > { %v4346_v11 = vadd.f32 %v6022_v41, %v7678_v22  ;;  %v4340_v42 = vpop.f32.mrb[89].mxu1 }
 0x357   : > { %v4341_v59 = vadd.f32 %v7678_v22, %v4340_v42 }
 0x358   : > { %5109 = vst.msk [vmem:[%s7683_s9 + $0x198] sm:$0xff] %vm4109_vm2, %v4346_v11 }
 0x359   : > { %5108 = vst.msk [vmem:[%s7683_s9 + $0x190] sm:$0xff] %vm4109_vm2, %v4341_v59  ;;  %v6025_v10 = vpop.f32.mrb[90].mxu1 }
 0x35a   : > { %v4356_v50 = vadd.f32 %v6025_v10, %v7678_v22  ;;  %v4350_v48 = vpop.f32.mrb[91].mxu1 }
 0x35b   : > { %v4351_v12 = vadd.f32 %v7678_v22, %v4350_v48 }
 0x35c   : > { %5111 = vst.msk [vmem:[%s7683_s9 + $0x1b8] sm:$0xff] %vm4109_vm2, %v4356_v50 }
 0x35d   : > { %5110 = vst.msk [vmem:[%s7683_s9 + $0x1b0] sm:$0xff] %vm4109_vm2, %v4351_v12  ;;  %v6028_v55 = vpop.f32.mrb[92].mxu1 }
 0x35e   : > { %v4366_v44 = vadd.f32 %v6028_v55, %v7678_v22  ;;  %v4360_v14 = vpop.f32.mrb[93].mxu1 }
 0x35f   : > { %v4361_v17 = vadd.f32 %v7678_v22, %v4360_v14 }
 0x360   : > { %5113 = vst.msk [vmem:[%s7683_s9 + $0x1d8] sm:$0xff] %vm4109_vm2, %v4366_v44 }
 0x361   : > { %5112 = vst.msk [vmem:[%s7683_s9 + $0x1d0] sm:$0xff] %vm4109_vm2, %v4361_v17  ;;  %v6031_v16 = vpop.f32.mrb[94].mxu1 }
 0x362   : > { %v4376_v21 = vadd.f32 %v6031_v16, %v7678_v22  ;;  %v4370_v26 = vpop.f32.mrb[95].mxu1 }
 0x363   : > { %v4371_v28 = vadd.f32 %v7678_v22, %v4370_v26 }
 0x364   : > { %5115 = vst.msk [vmem:[%s7683_s9 + $0x1f8] sm:$0xff] %vm4109_vm2, %v4376_v21 }
 0x365   : > { %5114 = vst.msk [vmem:[%s7683_s9 + $0x1f0] sm:$0xff] %vm4109_vm2, %v4371_v28 }
 0x366 PF: > { %s15_s20 = sadd.s32 1, %s6337_s20   ;;  %s7978_s18 = smov %s6333_s19 }
 0x367   : > { %p12_p5 = scmp.ge.s32.totalorder %s15_s20, 4   ;;  %s7979_s19 = smov %s7981_s21 }
 0x369   :  { %14 = sbr.rel (!%p12_p5) target bundleno = 2 (0x2), region = 83 }

</bundles_post_ra>
